<compile_context>
chip_gen: v5e
topology: v5e:2x2
jax: 0.10.0
libtpu: 0.0.40
codegen_flags: <defaults>
</compile_context>

<pallas_src>
import jax
import jax.numpy as jnp
from jax.experimental import pallas as pl
from jax.experimental.pallas import tpu as pltpu

OUT_PAD = 128  # lane-dense padded output width (true output width is 3)


def mlp_kernel(x_ref,
               w1_ref, b1_ref,
               w2_ref, b2_ref,
               w3_ref, b3_ref,
               w4_ref, b4_ref,
               w5_ref, b5_ref,
               o_ref):
    """Full 5-layer MLP forward on one batch tile, entirely in VMEM."""
    x = x_ref[...]                                                 # (TB, 1)

    # Layer 1 has K=1: a (TB,1)x(1,64) contraction is wasted MXU work, so do it
    # as a VPU broadcast multiply instead.
    h1 = jnp.tanh(x * w1_ref[...] + b1_ref[...])                   # (TB, 64)

    h2 = jnp.tanh(
        jnp.dot(h1, w2_ref[...], preferred_element_type=jnp.float32) + b2_ref[...])
    h3 = jnp.tanh(
        jnp.dot(h2, w3_ref[...], preferred_element_type=jnp.float32) + b3_ref[...])
    h4 = jnp.tanh(
        jnp.dot(h3, w4_ref[...], preferred_element_type=jnp.float32) + b4_ref[...])

    # Final layer: weights are zero-padded to 128 lanes so this store is a
    # full-lane (unmasked) vst.
    out = jnp.dot(h4, w5_ref[...], preferred_element_type=jnp.float32) + b5_ref[...]
    o_ref[...] = out.astype(o_ref.dtype)                           # (TB, 128)


def net_forward(x, params, *, batch_tile=256):
    """Run the PINN MLP forward via a single Pallas kernel, tiled over batch."""
    (w1, b1), (w2, b2), (w3, b3), (w4, b4), (w5, b5) = params
    N, in_dim = x.shape
    assert in_dim == 1
    out_dim = w5.shape[1]                                          # 3

    # Lane-dense output: zero-pad the last layer to OUT_PAD lanes.
    w5p = jnp.zeros((w5.shape[0], OUT_PAD), w5.dtype).at[:, :out_dim].set(w5)
    b5p = jnp.zeros((1, OUT_PAD), b5.dtype).at[:, :out_dim].set(b5)

    # Pad the batch so the grid covers N with full tiles (pad rows are junk and
    # sliced off below).
    n_tiles = pl.cdiv(N, batch_tile)
    n_pad = n_tiles * batch_tile
    if n_pad != N:
        x = jnp.pad(x, ((0, n_pad - N), (0, 0)))

    # Weights/biases are small (~66 KB); keep them resident (same block every
    # grid step, so they are not re-DMA'd).
    def full(shape):
        return pl.BlockSpec(shape, lambda i: (0, 0))

    out = pl.pallas_call(
        mlp_kernel,
        out_shape=jax.ShapeDtypeStruct((n_pad, OUT_PAD), jnp.float32),
        grid_spec=pltpu.PrefetchScalarGridSpec(
            num_scalar_prefetch=0,
            grid=(n_tiles,),
            in_specs=[
                pl.BlockSpec((batch_tile, in_dim), lambda i: (i, 0)),   # x tile
                full(w1.shape), full(b1.shape),
                full(w2.shape), full(b2.shape),
                full(w3.shape), full(b3.shape),
                full(w4.shape), full(b4.shape),
                full(w5p.shape), full(b5p.shape),
            ],
            out_specs=pl.BlockSpec((batch_tile, OUT_PAD), lambda i: (i, 0)),
        ),
        compiler_params=pltpu.CompilerParams(
            dimension_semantics=("parallel",)),
    )(x, w1, b1, w2, b2, w3, b3, w4, b4, w5p, b5p)

    return out[:N, :out_dim]


def init_params(key):
    """Deterministic init matching nn.Linear shapes (stored as (in, out))."""
    dims = [(1, 64), (64, 64), (64, 64), (64, 64), (64, 3)]
    params = []
    for (fan_in, fan_out) in dims:
        key, kw, kb = jax.random.split(key, 3)
        bound = 1.0 / jnp.sqrt(fan_in)
        w = jax.random.uniform(kw, (fan_in, fan_out), jnp.float32, -bound, bound)
        b = jax.random.uniform(kb, (1, fan_out), jnp.float32, -bound, bound)
        params.append((w, b))
    return params


def reference_forward(x, params):
    """Pure-JAX reference for correctness."""
    h = x
    for i, (w, b) in enumerate(params):
        h = h @ w + b
        if i < len(params) - 1:
            h = jnp.tanh(h)
    return h


# TODO(synk): loss1/lossbc1/lossbc2 use torch.autograd.grad (PINN residuals,
# d(out)/dx); the Pallas kernel has no automatic VJP, so gradient-based losses
# should either use the pure-JAX reference_forward path or a custom_vjp around
# net_forward. Only the forward pass is implemented here.

if __name__ == "__main__":
    key = jax.random.PRNGKey(0)
    params = init_params(key)

    # Radial coordinate input x: shape (N, 1), positive values (as in the PINN).
    # N is deliberately not a multiple of the batch tile to exercise padding.
    N = 300
    xkey = jax.random.fold_in(key, 123)
    x = jax.random.uniform(xkey, (N, 1), jnp.float32, 0.5, 1.5)

    out = net_forward(x, params, batch_tile=256)
    out = jax.block_until_ready(out)

    ref = reference_forward(x, params)
    assert out.shape == (N, 3), out.shape
    assert jnp.allclose(out, ref, atol=1e-5, rtol=1e-5), "mismatch vs reference"

    print("KERNEL_OK")
</pallas_src>

<mosaic_0001>
module attributes {stable_mosaic.version = 11 : i64} {
  func.func @mlp_kernel(%arg0: i32, %arg1: memref<256x1xf32, #tpu.memory_space<vmem>>, %arg2: memref<1x64xf32, #tpu.memory_space<vmem>>, %arg3: memref<1x64xf32, #tpu.memory_space<vmem>>, %arg4: memref<64x64xf32, #tpu.memory_space<vmem>>, %arg5: memref<1x64xf32, #tpu.memory_space<vmem>>, %arg6: memref<64x64xf32, #tpu.memory_space<vmem>>, %arg7: memref<1x64xf32, #tpu.memory_space<vmem>>, %arg8: memref<64x64xf32, #tpu.memory_space<vmem>>, %arg9: memref<1x64xf32, #tpu.memory_space<vmem>>, %arg10: memref<64x128xf32, #tpu.memory_space<vmem>>, %arg11: memref<1x128xf32, #tpu.memory_space<vmem>>, %arg12: memref<256x128xf32, #tpu.memory_space<vmem>>) attributes {dimension_semantics = [#tpu.dimension_semantics<parallel>], iteration_bounds = array<i64: 2>, scalar_prefetch = 0 : i64, scratch_operands = 0 : i64, tpu.core_type = #tpu.core_type<tc>, window_params = [{transform_indices = @transform_0, window_bounds = array<i64: 256, 1>}, {pipeline_mode = #tpu.pipeline_mode<synchronous>, transform_indices = @transform_1, window_bounds = array<i64: 1, 64>}, {pipeline_mode = #tpu.pipeline_mode<synchronous>, transform_indices = @transform_2, window_bounds = array<i64: 1, 64>}, {pipeline_mode = #tpu.pipeline_mode<synchronous>, transform_indices = @transform_3, window_bounds = array<i64: 64, 64>}, {pipeline_mode = #tpu.pipeline_mode<synchronous>, transform_indices = @transform_4, window_bounds = array<i64: 1, 64>}, {pipeline_mode = #tpu.pipeline_mode<synchronous>, transform_indices = @transform_5, window_bounds = array<i64: 64, 64>}, {pipeline_mode = #tpu.pipeline_mode<synchronous>, transform_indices = @transform_6, window_bounds = array<i64: 1, 64>}, {pipeline_mode = #tpu.pipeline_mode<synchronous>, transform_indices = @transform_7, window_bounds = array<i64: 64, 64>}, {pipeline_mode = #tpu.pipeline_mode<synchronous>, transform_indices = @transform_8, window_bounds = array<i64: 1, 64>}, {pipeline_mode = #tpu.pipeline_mode<synchronous>, transform_indices = @transform_9, window_bounds = array<i64: 64, 128>}, {pipeline_mode = #tpu.pipeline_mode<synchronous>, transform_indices = @transform_10, window_bounds = array<i64: 1, 128>}, {transform_indices = @transform_11, window_bounds = array<i64: 256, 128>}]} {
    %c0 = arith.constant 0 : index
    %c0_0 = arith.constant 0 : index
    %0 = vector.load %arg1[%c0, %c0_0] : memref<256x1xf32, #tpu.memory_space<vmem>>, vector<256x1xf32>
    %c0_1 = arith.constant 0 : index
    %c0_2 = arith.constant 0 : index
    %1 = vector.load %arg2[%c0_1, %c0_2] : memref<1x64xf32, #tpu.memory_space<vmem>>, vector<1x64xf32>
    %2 = vector.broadcast %0 : vector<256x1xf32> to vector<256x64xf32>
    %3 = vector.broadcast %1 : vector<1x64xf32> to vector<256x64xf32>
    %4 = arith.mulf %2, %3 : vector<256x64xf32>
    %c0_3 = arith.constant 0 : index
    %c0_4 = arith.constant 0 : index
    %5 = vector.load %arg3[%c0_3, %c0_4] : memref<1x64xf32, #tpu.memory_space<vmem>>, vector<1x64xf32>
    %6 = vector.broadcast %5 : vector<1x64xf32> to vector<256x64xf32>
    %7 = arith.addf %4, %6 : vector<256x64xf32>
    %8 = math.tanh %7 : vector<256x64xf32>
    %c0_5 = arith.constant 0 : index
    %c0_6 = arith.constant 0 : index
    %9 = vector.load %arg4[%c0_5, %c0_6] : memref<64x64xf32, #tpu.memory_space<vmem>>, vector<64x64xf32>
    %cst = arith.constant dense<0.000000e+00> : vector<256x64xf32>
    %10 = tpu.matmul %8, %9, %cst {dimension_numbers = #tpu.dot_dimension_numbers<[1], [0], [0], [1], [0, 0, 1, 1], [], []>} : vector<256x64xf32>, vector<64x64xf32>, vector<256x64xf32> -> vector<256x64xf32>
    %c0_7 = arith.constant 0 : index
    %c0_8 = arith.constant 0 : index
    %11 = vector.load %arg5[%c0_7, %c0_8] : memref<1x64xf32, #tpu.memory_space<vmem>>, vector<1x64xf32>
    %12 = vector.broadcast %11 : vector<1x64xf32> to vector<256x64xf32>
    %13 = arith.addf %10, %12 : vector<256x64xf32>
    %14 = math.tanh %13 : vector<256x64xf32>
    %c0_9 = arith.constant 0 : index
    %c0_10 = arith.constant 0 : index
    %15 = vector.load %arg6[%c0_9, %c0_10] : memref<64x64xf32, #tpu.memory_space<vmem>>, vector<64x64xf32>
    %cst_11 = arith.constant dense<0.000000e+00> : vector<256x64xf32>
    %16 = tpu.matmul %14, %15, %cst_11 {dimension_numbers = #tpu.dot_dimension_numbers<[1], [0], [0], [1], [0, 0, 1, 1], [], []>} : vector<256x64xf32>, vector<64x64xf32>, vector<256x64xf32> -> vector<256x64xf32>
    %c0_12 = arith.constant 0 : index
    %c0_13 = arith.constant 0 : index
    %17 = vector.load %arg7[%c0_12, %c0_13] : memref<1x64xf32, #tpu.memory_space<vmem>>, vector<1x64xf32>
    %18 = vector.broadcast %17 : vector<1x64xf32> to vector<256x64xf32>
    %19 = arith.addf %16, %18 : vector<256x64xf32>
    %20 = math.tanh %19 : vector<256x64xf32>
    %c0_14 = arith.constant 0 : index
    %c0_15 = arith.constant 0 : index
    %21 = vector.load %arg8[%c0_14, %c0_15] : memref<64x64xf32, #tpu.memory_space<vmem>>, vector<64x64xf32>
    %cst_16 = arith.constant dense<0.000000e+00> : vector<256x64xf32>
    %22 = tpu.matmul %20, %21, %cst_16 {dimension_numbers = #tpu.dot_dimension_numbers<[1], [0], [0], [1], [0, 0, 1, 1], [], []>} : vector<256x64xf32>, vector<64x64xf32>, vector<256x64xf32> -> vector<256x64xf32>
    %c0_17 = arith.constant 0 : index
    %c0_18 = arith.constant 0 : index
    %23 = vector.load %arg9[%c0_17, %c0_18] : memref<1x64xf32, #tpu.memory_space<vmem>>, vector<1x64xf32>
    %24 = vector.broadcast %23 : vector<1x64xf32> to vector<256x64xf32>
    %25 = arith.addf %22, %24 : vector<256x64xf32>
    %26 = math.tanh %25 : vector<256x64xf32>
    %c0_19 = arith.constant 0 : index
    %c0_20 = arith.constant 0 : index
    %27 = vector.load %arg10[%c0_19, %c0_20] : memref<64x128xf32, #tpu.memory_space<vmem>>, vector<64x128xf32>
    %cst_21 = arith.constant dense<0.000000e+00> : vector<256x128xf32>
    %28 = tpu.matmul %26, %27, %cst_21 {dimension_numbers = #tpu.dot_dimension_numbers<[1], [0], [0], [1], [0, 0, 1, 1], [], []>} : vector<256x64xf32>, vector<64x128xf32>, vector<256x128xf32> -> vector<256x128xf32>
    %c0_22 = arith.constant 0 : index
    %c0_23 = arith.constant 0 : index
    %29 = vector.load %arg11[%c0_22, %c0_23] : memref<1x128xf32, #tpu.memory_space<vmem>>, vector<1x128xf32>
    %30 = vector.broadcast %29 : vector<1x128xf32> to vector<256x128xf32>
    %31 = arith.addf %28, %30 : vector<256x128xf32>
    %c0_24 = arith.constant 0 : index
    %c0_25 = arith.constant 0 : index
    %32 = vector.load %arg12[%c0_24, %c0_25] : memref<256x128xf32, #tpu.memory_space<vmem>>, vector<256x128xf32>
    tpu.vector_store %arg12[%c0_24, %c0_25], %31 {strides = array<i32>} : memref<256x128xf32, #tpu.memory_space<vmem>>, vector<256x128xf32>,
    return
  }
  func.func @transform_0(%arg0: i32) -> (i32, i32) {
    %c0_i32 = arith.constant 0 : i32
    %c0_i32_0 = arith.constant 0 : i32
    return %arg0, %c0_i32 : i32, i32
  }
  func.func @transform_1(%arg0: i32) -> (i32, i32) {
    %c0_i32 = arith.constant 0 : i32
    %c0_i32_0 = arith.constant 0 : i32
    %c0_i32_1 = arith.constant 0 : i32
    return %c0_i32, %c0_i32_0 : i32, i32
  }
  func.func @transform_2(%arg0: i32) -> (i32, i32) {
    %c0_i32 = arith.constant 0 : i32
    %c0_i32_0 = arith.constant 0 : i32
    %c0_i32_1 = arith.constant 0 : i32
    return %c0_i32, %c0_i32_0 : i32, i32
  }
  func.func @transform_3(%arg0: i32) -> (i32, i32) {
    %c0_i32 = arith.constant 0 : i32
    %c0_i32_0 = arith.constant 0 : i32
    %c0_i32_1 = arith.constant 0 : i32
    return %c0_i32, %c0_i32_0 : i32, i32
  }
  func.func @transform_4(%arg0: i32) -> (i32, i32) {
    %c0_i32 = arith.constant 0 : i32
    %c0_i32_0 = arith.constant 0 : i32
    %c0_i32_1 = arith.constant 0 : i32
    return %c0_i32, %c0_i32_0 : i32, i32
  }
  func.func @transform_5(%arg0: i32) -> (i32, i32) {
    %c0_i32 = arith.constant 0 : i32
    %c0_i32_0 = arith.constant 0 : i32
    %c0_i32_1 = arith.constant 0 : i32
    return %c0_i32, %c0_i32_0 : i32, i32
  }
  func.func @transform_6(%arg0: i32) -> (i32, i32) {
    %c0_i32 = arith.constant 0 : i32
    %c0_i32_0 = arith.constant 0 : i32
    %c0_i32_1 = arith.constant 0 : i32
    return %c0_i32, %c0_i32_0 : i32, i32
  }
  func.func @transform_7(%arg0: i32) -> (i32, i32) {
    %c0_i32 = arith.constant 0 : i32
    %c0_i32_0 = arith.constant 0 : i32
    %c0_i32_1 = arith.constant 0 : i32
    return %c0_i32, %c0_i32_0 : i32, i32
  }
  func.func @transform_8(%arg0: i32) -> (i32, i32) {
    %c0_i32 = arith.constant 0 : i32
    %c0_i32_0 = arith.constant 0 : i32
    %c0_i32_1 = arith.constant 0 : i32
    return %c0_i32, %c0_i32_0 : i32, i32
  }
  func.func @transform_9(%arg0: i32) -> (i32, i32) {
    %c0_i32 = arith.constant 0 : i32
    %c0_i32_0 = arith.constant 0 : i32
    %c0_i32_1 = arith.constant 0 : i32
    return %c0_i32, %c0_i32_0 : i32, i32
  }
  func.func @transform_10(%arg0: i32) -> (i32, i32) {
    %c0_i32 = arith.constant 0 : i32
    %c0_i32_0 = arith.constant 0 : i32
    %c0_i32_1 = arith.constant 0 : i32
    return %c0_i32, %c0_i32_0 : i32, i32
  }
  func.func @transform_11(%arg0: i32) -> (i32, i32) {
    %c0_i32 = arith.constant 0 : i32
    %c0_i32_0 = arith.constant 0 : i32
    return %arg0, %c0_i32 : i32, i32
  }
}

</mosaic_0001>

<bundles_post_ra>
// kernel: tpu_custom_call.1
= control target key start
LH: loop header
LB: loop body
LE: loop exit
PB: predicated region body
PF: predicated region fallthrough
CT: control target
= control target key end

     0   :  { %s2953_s0 = inlined_call_operand.vmem [shape: f32[512,1], index: 0, kind: input, shape index: {}]   ;;  %s2954_s1 = inlined_call_operand.vmem [shape: f32[1,64], index: 1, kind: input, shape index: {}]   ;;  %s2955_s2 = inlined_call_operand.vmem [shape: f32[1,64], index: 2, kind: input, shape index: {}]   ;;  %s2956_s3 = inlined_call_operand.vmem [shape: f32[64,64], index: 3, kind: input, shape index: {}]   ;;  %s2957_s4 = inlined_call_operand.vmem [shape: f32[1,64], index: 4, kind: input, shape index: {}]   ;;  %s2958_s5 = inlined_call_operand.vmem [shape: f32[64,64], index: 5, kind: input, shape index: {}]   ;;  %s2959_s6 = inlined_call_operand.vmem [shape: f32[1,64], index: 6, kind: input, shape index: {}]   ;;  %s2960_s7 = inlined_call_operand.vmem [shape: f32[64,64], index: 7, kind: input, shape index: {}]   ;;  %s2961_s8 = inlined_call_operand.vmem [shape: f32[1,64], index: 8, kind: input, shape index: {}]   ;;  %s2962_s9 = inlined_call_operand.vmem [shape: f32[64,128], index: 9, kind: input, shape index: {}]   ;;  %s2963_s10 = inlined_call_operand.vmem [shape: f32[1,128], index: 10, kind: input, shape index: {}]   ;;  %s2964_s11 = inlined_call_operand.hbm [shape: f32[512,128], index: 11, kind: output, shape index: {}]  }
   0x1   :  { %2965 = sst [smem:[#allocation5_spill]] %s2953_s0 }
   0x2   :  { %16 = vsyncpa [#allocation3], 0 }
   0x3   :  { %18 = vsyncpa [#allocation3 + $0x1], 0  ;;  %s2350_s17 = smov 0   ;;  %s2352_s18 = smov 0  }
   0x4   :  { %s2354_s19 = smov 0   ;;  %s2356_s20 = smov 0  }
   0x5 LB: > { %s2371_s21 = sadd.s32 4294967295, %s2285_s20   ;;  %s1775_s22 = sadd.s32 4294967294, %s2285_s20   ;;  %s2285_s20 = sphi %s2356_s20, %s2972_s20   ;;  %s2281_s19 = sphi %s2354_s19, %s2971_s19   ;;  %s2277_s18 = sphi %s2352_s18, %s2970_s18   ;;  %s2273_s17 = sphi %s2350_s17, %s2969_s17  }
   0x6   : > { %s2375_s23 = sadd.s32 1, %s2285_s20   ;;  %s267_s24 = sadd.s32 1, %s2281_s19 }
   0x7   : > { %s264_s25 = ssub.s32 %s2285_s20, %s2375_s23  ;;  %p277_p0 = scmp.ne.s32.totalorder %s2281_s19, %s2277_s18 }
   0x8   : > { %p265_p1 = scmp.eq.s32.totalorder %s264_s25, 0  ;;  %p278_p2 = scmp.eq.s32.totalorder %s2371_s21, 1 }
   0x9   : > { %p283_p3 = scmp.ne.s32.totalorder %s2277_s18, %s2273_s17  ;;  %p284_p4 = scmp.eq.s32.totalorder %s1775_s22, 1 }
   0xa   : > { %s2386_s26 = scalar_select %p265_p1, %s2281_s19, %s267_s24  }
   0xb   : > { %p2388_p5 = por %p278_p2, %p277_p0  ;;  %p2392_p6 = por %p284_p4, %p283_p3 }
   0xc   : > { %p1778_p7 = scmp.ge.s32.totalorder %s2285_s20, 1  ;;  %p341_p8 = scmp.lt.s32.totalorder %s2285_s20, 3 }
   0xe   : > { %p342_p9 = pnand %p1778_p7, %p341_p8 }
   0xf   : > { %s1780_s29 = sshll.u32 (!%p342_p9), %s2371_s21, 5  ;;  %s2968_s0 = sld [smem:[#allocation5_spill]] (!%p342_p9) }
  0x10   : > { %345 = sbr.rel (%p342_p9) target bundleno = 949 (0x3b5), region = 64  ;;  %p382_p10 = scmp.lt.s32.totalorder (!%p342_p9), %s1780_s29, 63 }
  0x11   : > { %s378_s25 = sand.u32 (!%p342_p9), 1, %s2277_s18   ;;  %s2243_s16 = scalar_lea.hbm (!%p342_p9), %s2964_s11, 512 }
  0x15   : > { %v2287_v0 = vmov 0   ;;  %s2974_s29 = smov (!%p382_p10, %s1780_s29), 63  ;;  %v691_v33 = vld [vmem:[%s2956_s3 + $0x38] sm:$0xff]  ;;  %v690_v34 = vld [vmem:[%s2956_s3 + $0x30] sm:$0xff]  ;;  %v689_v35 = vld [vmem:[%s2956_s3 + $0x28] sm:$0xff]  ;;  %vm696_vm0 = vcmask 523264  }
  0x16   : > { %1960 = vset.pattern.permute.xlu2 %v2287_v0  ;;  %1959 = vset.pattern.permute.xlu1 %v2287_v0  ;;  %s1781_s30 = sshll.u32 %s2974_s29, 3  ;;  %v688_v36 = vld [vmem:[%s2956_s3 + $0x20] sm:$0xff]  ;;  %v687_v37 = vld [vmem:[%s2956_s3 + $0x18] sm:$0xff]  ;;  %v686_v38 = vld [vmem:[%s2956_s3 + $0x10] sm:$0xff]  ;;  %s1779_s29 = sshll.u32 %s378_s25, 8 }
  0x17   : > { %1958 = vset.pattern.permute.xlu0 %v2287_v0  ;;  %s2402_s14 = scalar_lea.vmem %s2968_s0, %s1781_s30  ;;  %801 = vmatpush.msra.mxu0 %v691_v33  ;;  %v685_v39 = vld [vmem:[%s2956_s3 + $0x8] sm:$0xff]  ;;  %v684_v40 = vld [vmem:[%s2956_s3] sm:$0xff]  ;;  %s2825_s13 = scalar_lea.vmem [#allocation2], %s1779_s29 }
  0x18   : > { %v392_v1 = vld [vmem:[%s2402_s14 + $0x20] sm:$0xff]  ;;  %v390_v2 = vld [vmem:[%s2402_s14 + $0x10] sm:$0xff]  ;;  %v393_v4 = vld [vmem:[%s2402_s14 + $0x28] sm:$0xff]  ;;  %s1710_s24 = sshll.u32 %s2825_s13, 4  ;;  %s1698_s30 = scalar_lea.sflag [#allocation3], %s378_s25  ;;  %s1711_s24 = int_to_ptr.vmem [resolvable:$true] %s1710_s24 }
  0x19   : > { %v388_v3 = vld [vmem:[%s2402_s14] sm:$0xff]  ;;  %443 = vperm.xlu2 %1960, %v392_v1   ;;  %433 = vperm.xlu1 %1959, %v390_v2   ;;  %v391_v5 = vld [vmem:[%s2402_s14 + $0x18] sm:$0xff]  ;;  %v389_v6 = vld [vmem:[%s2402_s14 + $0x8] sm:$0xff] }
  0x1a   : > { %423 = vperm.xlu0 %1958, %v388_v3   ;;  %v396_v7 = vld [vmem:[%s2402_s14 + $0x40] sm:$0xff]  ;;  %v395_v8 = vld [vmem:[%s2402_s14 + $0x38] sm:$0xff]  ;;  %v394_v9 = vld [vmem:[%s2402_s14 + $0x30] sm:$0xff]  ;;  %802 = vmatpush.msra.mxu0 %v690_v34 }
  0x1b   : > { %v399_v10 = vld [vmem:[%s2402_s14 + $0x58] sm:$0xff]  ;;  %v398_v11 = vld [vmem:[%s2402_s14 + $0x50] sm:$0xff]  ;;  %v397_v12 = vld [vmem:[%s2402_s14 + $0x48] sm:$0xff] }
  0x1c   : > { %v402_v13 = vld [vmem:[%s2402_s14 + $0x70] sm:$0xff]  ;;  %v401_v14 = vld [vmem:[%s2402_s14 + $0x68] sm:$0xff]  ;;  %v400_v15 = vld [vmem:[%s2402_s14 + $0x60] sm:$0xff]  ;;  %803 = vmatpush.msra.mxu0 %v689_v35 }
  0x1d   : > { %v405_v16 = vld [vmem:[%s2402_s14 + $0x88] sm:$0xff]  ;;  %v404_v17 = vld [vmem:[%s2402_s14 + $0x80] sm:$0xff]  ;;  %v403_v18 = vld [vmem:[%s2402_s14 + $0x78] sm:$0xff] }
  0x1e   : > { %v408_v19 = vld [vmem:[%s2402_s14 + $0xa0] sm:$0xff]  ;;  %v407_v20 = vld [vmem:[%s2402_s14 + $0x98] sm:$0xff]  ;;  %v406_v21 = vld [vmem:[%s2402_s14 + $0x90] sm:$0xff]  ;;  %804 = vmatpush.msra.mxu0 %v688_v36 }
  0x1f   : > { %v411_v22 = vld [vmem:[%s2402_s14 + $0xb8] sm:$0xff]  ;;  %v410_v23 = vld [vmem:[%s2402_s14 + $0xb0] sm:$0xff]  ;;  %v409_v24 = vld [vmem:[%s2402_s14 + $0xa8] sm:$0xff] }
  0x20   : > { %v414_v25 = vld [vmem:[%s2402_s14 + $0xd0] sm:$0xff]  ;;  %v413_v26 = vld [vmem:[%s2402_s14 + $0xc8] sm:$0xff]  ;;  %v412_v27 = vld [vmem:[%s2402_s14 + $0xc0] sm:$0xff]  ;;  %805 = vmatpush.msra.mxu0 %v687_v37 }
  0x21   : > { %448 = vperm.xlu2 %1960, %v393_v4   ;;  %438 = vperm.xlu1 %1959, %v391_v5   ;;  %v417_v28 = vld [vmem:[%s2402_s14 + $0xe8] sm:$0xff]  ;;  %v416_v29 = vld [vmem:[%s2402_s14 + $0xe0] sm:$0xff]  ;;  %v415_v30 = vld [vmem:[%s2402_s14 + $0xd8] sm:$0xff] }
  0x22   : > { %428 = vperm.xlu0 %1958, %v389_v6   ;;  %v419_v31 = vld [vmem:[%s2402_s14 + $0xf8] sm:$0xff]  ;;  %v418_v32 = vld [vmem:[%s2402_s14 + $0xf0] sm:$0xff]  ;;  %806 = vmatpush.msra.mxu0 %v686_v38  ;;  %v2463_v41 = vld [vmem:[%s2954_s1] ss:$0 sm:$0xff]  ;;  %s1915_s14 = sshll.u32 %s2371_s21, 8 }
  0x23   : > { %v2468_v42 = vld [vmem:[%s2955_s2] ss:$0 sm:$0xff]  ;;  %v943_v34 = vld [vmem:[%s2958_s5 + $0x28] sm:$0xff]  ;;  %v941_v38 = vld [vmem:[%s2958_s5 + $0x18] sm:$0xff]  ;;  %s1709_s22 = scalar_lea.hbm %s2964_s11, %s1915_s14 }
  0x24   : > { %807 = vmatpush.msra.mxu0 %v685_v39  ;;  %v942_v36 = vld [vmem:[%s2958_s5 + $0x20] sm:$0xff]  ;;  %s1712_s29 = sshll.u32 %s1709_s22, 4  ;;  %s1713_s29 = int_to_ptr.hbm [resolvable:$true] %s1712_s29 }
  0x25   : > { %s2237_s21 = sshra.s32 %s1713_s29, 4  ;;  %s2238_s21 = int_to_ptr.hbm [resolvable:$true] %s2237_s21 }
  0x26   : > { %808 = vmatpush.msra.mxu0 %v684_v40  ;;  %v940_v40 = vld [vmem:[%s2958_s5 + $0x10] sm:$0xff]  ;;  %s2239_s12 = scalar_lea.hbm %s2238_s21, 256  ;;  %p2244_p0 = scmp.lt.s32.totalorder %s2238_s21, %s2964_s11 }
  0x27   : > { %p2240_p11 = scmp.ne.s32.totalorder %s2238_s21, %s2239_s12  ;;  %p2245_p1 = scmp.lt.s32.totalorder %s2243_s16, %s2239_s12 }
  0x29   : > { %463 = vperm.xlu2 %1960, %v396_v7   ;;  %458 = vperm.xlu1 %1959, %v395_v8   ;;  %p2241_p12 = pnand %p2240_p11, %p2388_p5  ;;  %p2246_p2 = por %p2245_p1, %p2244_p0 }
  0x2a   : > { %453 = vperm.xlu0 %1958, %v394_v9  }
  0x2b   : > { %p2242_p13 = pneg %p2241_p12 }
  0x2d   : > { %p2247_p3 = pnand %p2246_p2, %p2242_p13 }
  0x31   : > { %478 = vperm.xlu2 %1960, %v399_v10   ;;  %473 = vperm.xlu1 %1959, %v398_v11  }
  0x32   : > { %468 = vperm.xlu0 %1958, %v397_v12  }
  0x39   : > { %493 = vperm.xlu2 %1960, %v402_v13   ;;  %488 = vperm.xlu1 %1959, %v401_v14  }
  0x3a   : > { %483 = vperm.xlu0 %1958, %v400_v15  }
  0x41   : > { %508 = vperm.xlu2 %1960, %v405_v16   ;;  %503 = vperm.xlu1 %1959, %v404_v17  }
  0x42   : > { %498 = vperm.xlu0 %1958, %v403_v18  }
  0x49   : > { %523 = vperm.xlu2 %1960, %v408_v19   ;;  %518 = vperm.xlu1 %1959, %v407_v20  }
  0x4a   : > { %513 = vperm.xlu0 %1958, %v406_v21  }
  0x51   : > { %538 = vperm.xlu2 %1960, %v411_v22   ;;  %533 = vperm.xlu1 %1959, %v410_v23  }
  0x52   : > { %528 = vperm.xlu0 %1958, %v409_v24  }
  0x59   : > { %553 = vperm.xlu2 %1960, %v414_v25   ;;  %548 = vperm.xlu1 %1959, %v413_v26  }
  0x5a   : > { %543 = vperm.xlu0 %1958, %v412_v27  }
  0x61   : > { %568 = vperm.xlu2 %1960, %v417_v28   ;;  %563 = vperm.xlu1 %1959, %v416_v29  }
  0x62   : > { %558 = vperm.xlu0 %1958, %v415_v30  }
  0x69   : > { %578 = vperm.xlu1 %1959, %v419_v31   ;;  %v945_v31 = vld [vmem:[%s2958_s5 + $0x38] sm:$0xff] }
  0x6a   : > { %573 = vperm.xlu0 %1958, %v418_v32   ;;  %1054 = vmatpush.msra.mxu1 %v945_v31  ;;  %v944_v32 = vld [vmem:[%s2958_s5 + $0x30] sm:$0xff] }
  0x6c   : > { %1055 = vmatpush.msra.mxu1 %v944_v32 }
  0x6e   : > { %1056 = vmatpush.msra.mxu1 %v943_v34 }
  0x70   : > { %1057 = vmatpush.msra.mxu1 %v942_v36 }
  0x72   : > { %1058 = vmatpush.msra.mxu1 %v941_v38 }
  0x73   : > { %v444_v58 = vpop.permute.xlu2 %443 }
  0x74   : > { %v588_v59 = vmul.f32 %v2463_v41, %v444_v58  ;;  %1059 = vmatpush.msra.mxu1 %v940_v40  ;;  %v2548_v58 = vld [vmem:[%s2957_s4] ss:$0 sm:$0xff] }
  0x76   : > { %v624_v60 = vadd.f32 %v2468_v42, %v588_v59 }
  0x7b   : > { %v449_v62 = vpop.permute.xlu2 %448 }
  0x7c   : > { %v589_v63 = vmul.f32 %v2463_v41, %v449_v62 }
  0x7e   : > { %v625_v1 = vadd.f32 %v2468_v42, %v589_v63 }
  0x83   : > { %v464_v10 = vpop.permute.xlu2 %463 }
  0x84   : > { %v592_v11 = vmul.f32 %v2463_v41, %v464_v10 }
  0x86   : > { %v628_v12 = vadd.f32 %v2468_v42, %v592_v11 }
  0x8b   : > { %v434_v48 = vpop.permute.xlu1 %433  ;;  %v479_v22 = vpop.permute.xlu2 %478 }
  0x8c   : > { %v424_v43 = vpop.permute.xlu0 %423  ;;  %v586_v51 = vmul.f32 %v2463_v41, %v434_v48  ;;  %v595_v23 = vmul.f32 %v2463_v41, %v479_v22 }
  0x8d   : > { %v584_v44 = vmul.f32 %v2463_v41, %v424_v43 }
  0x8e   : > { %v622_v52 = vadd.f32 %v2468_v42, %v586_v51  ;;  %v631_v24 = vadd.f32 %v2468_v42, %v595_v23 }
  0x8f   : > { %v620_v45 = vadd.f32 %v2468_v42, %v584_v44  ;;  %v939_v44 = vld [vmem:[%s2958_s5 + $0x8] sm:$0xff] }
  0x90   : > { %1060 = vmatpush.msra.mxu1 %v939_v44 }
  0x91   : > { %1967 = vtanh.f32 %v620_v45 }
  0x93   : > { %v439_v54 = vpop.permute.xlu1 %438  ;;  %v494_v39 = vpop.permute.xlu2 %493 }
  0x94   : > { %v429_v46 = vpop.permute.xlu0 %428  ;;  %v587_v55 = vmul.f32 %v2463_v41, %v439_v54  ;;  %v598_v43 = vmul.f32 %v2463_v41, %v494_v39 }
  0x95   : > { %v585_v47 = vmul.f32 %v2463_v41, %v429_v46  ;;  %v938_v46 = vld [vmem:[%s2958_s5] sm:$0xff] }
  0x96   : > { %v623_v57 = vadd.f32 %v2468_v42, %v587_v55  ;;  %v634_v45 = vadd.f32 %v2468_v42, %v598_v43  ;;  %1061 = vmatpush.msra.mxu1 %v938_v46 }
  0x97   : > { %v621_v49 = vadd.f32 %v2468_v42, %v585_v47  ;;  %v1968_v50 = vpop.eup %1967 }
  0x98   : > { %1782 = vmatmul.msk.f32.vlgmr.msra.gmra.mxu0 %vm696_vm0, %v1968_v50 }
  0x99   : > { %1969 = vtanh.f32 %v621_v49 }
  0x9a   : > { %1971 = vtanh.f32 %v622_v52 }
  0x9b   : > { %1973 = vtanh.f32 %v623_v57  ;;  %v459_v5 = vpop.permute.xlu1 %458 }
  0x9c   : > { %1975 = vtanh.f32 %v624_v60  ;;  %v454_v2 = vpop.permute.xlu0 %453  ;;  %v591_v7 = vmul.f32 %v2463_v41, %v459_v5 }
  0x9d   : > { %1977 = vtanh.f32 %v625_v1  ;;  %v590_v3 = vmul.f32 %v2463_v41, %v454_v2 }
  0x9e   : > { %v627_v8 = vadd.f32 %v2468_v42, %v591_v7 }
  0x9f   : > { %v1970_v53 = vpop.eup %1969  ;;  %v626_v4 = vadd.f32 %v2468_v42, %v590_v3 }
  0xa0   : > { %1783 = vmatmul.msk.f32.gmra.mxu0 %vm696_vm0, %v1970_v53  ;;  %v1972_v56 = vpop.eup %1971 }
  0xa1   : > { %v1974_v61 = vpop.eup %1973  ;;  %1979 = vtanh.f32 %v626_v4 }
  0xa2   : > { %v1976_v0 = vpop.eup %1975  ;;  %1981 = vtanh.f32 %v627_v8 }
  0xa3   : > { %v1978_v6 = vpop.eup %1977  ;;  %1983 = vtanh.f32 %v628_v12  ;;  %v474_v17 = vpop.permute.xlu1 %473 }
  0xa4   : > { %v469_v13 = vpop.permute.xlu0 %468  ;;  %v594_v19 = vmul.f32 %v2463_v41, %v474_v17 }
  0xa5   : > { %v593_v15 = vmul.f32 %v2463_v41, %v469_v13 }
  0xa6   : > { %v630_v20 = vadd.f32 %v2468_v42, %v594_v19 }
  0xa7   : > { %v1980_v9 = vpop.eup %1979  ;;  %v629_v16 = vadd.f32 %v2468_v42, %v593_v15 }
  0xa8   : > { %1784 = vmatmul.msk.f32.gmra.mxu0 %vm696_vm0, %v1972_v56  ;;  %v1982_v14 = vpop.eup %1981  ;;  %v509_v56 = vpop.permute.xlu2 %508 }
  0xa9   : > { %v1984_v18 = vpop.eup %1983  ;;  %1985 = vtanh.f32 %v629_v16  ;;  %v601_v57 = vmul.f32 %v2463_v41, %v509_v56 }
  0xaa   : > { %1987 = vtanh.f32 %v630_v20 }
  0xab   : > { %1989 = vtanh.f32 %v631_v24  ;;  %v489_v29 = vpop.permute.xlu1 %488  ;;  %v637_v59 = vadd.f32 %v2468_v42, %v601_v57 }
  0xac   : > { %v484_v25 = vpop.permute.xlu0 %483  ;;  %v597_v33 = vmul.f32 %v2463_v41, %v489_v29 }
  0xad   : > { %v596_v27 = vmul.f32 %v2463_v41, %v484_v25 }
  0xae   : > { %v633_v35 = vadd.f32 %v2468_v42, %v597_v33 }
  0xaf   : > { %v1986_v21 = vpop.eup %1985  ;;  %v632_v28 = vadd.f32 %v2468_v42, %v596_v27 }
  0xb0   : > { %1785 = vmatmul.msk.f32.gmra.mxu0 %vm696_vm0, %v1974_v61  ;;  %v1988_v26 = vpop.eup %1987  ;;  %v524_v13 = vpop.permute.xlu2 %523 }
  0xb1   : > { %v1990_v30 = vpop.eup %1989  ;;  %1991 = vtanh.f32 %v632_v28 }
  0xb2   : > { %1993 = vtanh.f32 %v633_v35 }
  0xb3   : > { %1995 = vtanh.f32 %v634_v45  ;;  %v504_v51 = vpop.permute.xlu1 %503 }
  0xb4   : > { %v499_v47 = vpop.permute.xlu0 %498  ;;  %v600_v53 = vmul.f32 %v2463_v41, %v504_v51 }
  0xb5   : > { %v599_v49 = vmul.f32 %v2463_v41, %v499_v47 }
  0xb6   : > { %v636_v54 = vadd.f32 %v2468_v42, %v600_v53 }
  0xb7   : > { %v1992_v37 = vpop.eup %1991  ;;  %v635_v50 = vadd.f32 %v2468_v42, %v599_v49 }
  0xb8   : > { %1786 = vmatmul.msk.f32.gmra.mxu0 %vm696_vm0, %v1976_v0  ;;  %v1994_v48 = vpop.eup %1993  ;;  %v539_v32 = vpop.permute.xlu2 %538 }
  0xb9   : > { %v1996_v52 = vpop.eup %1995  ;;  %1997 = vtanh.f32 %v635_v50  ;;  %v607_v35 = vmul.f32 %v2463_v41, %v539_v32 }
  0xba   : > { %1999 = vtanh.f32 %v636_v54 }
  0xbb   : > { %v519_v4 = vpop.permute.xlu1 %518  ;;  %v643_v36 = vadd.f32 %v2468_v42, %v607_v35  ;;  %v1193_v35 = vld [vmem:[%s2960_s7 + $0x10] sm:$0xff] }
  0xbc   : > { %v514_v61 = vpop.permute.xlu0 %513  ;;  %v603_v7 = vmul.f32 %v2463_v41, %v519_v4 }
  0xbd   : > { %v602_v0 = vmul.f32 %v2463_v41, %v514_v61 }
  0xbe   : > { %v639_v8 = vadd.f32 %v2468_v42, %v603_v7 }
  0xbf   : > { %v1998_v55 = vpop.eup %1997  ;;  %v638_v1 = vadd.f32 %v2468_v42, %v602_v0 }
  0xc0   : > { %1787 = vmatmul.msk.f32.gmra.mxu0 %vm696_vm0, %v1978_v6  ;;  %v2000_v63 = vpop.eup %1999 }
  0xc3   : > { %v534_v25 = vpop.permute.xlu1 %533 }
  0xc4   : > { %v606_v28 = vmul.f32 %v2463_v41, %v534_v25  ;;  %v1196_v25 = vld [vmem:[%s2960_s7 + $0x28] sm:$0xff] }
  0xc6   : > { %v642_v29 = vadd.f32 %v2468_v42, %v606_v28 }
  0xc8   : > { %1788 = vmatmul.msk.f32.gmra.mxu0 %vm696_vm0, %v1980_v9 }
  0xd0   : > { %1789 = vmatmul.msk.f32.gmra.mxu0 %vm696_vm0, %v1982_v14  ;;  %v604_v14 = vmul.f32 %v2463_v41, %v524_v13 }
  0xd2   : > { %v640_v15 = vadd.f32 %v2468_v42, %v604_v14 }
  0xd8   : > { %1790 = vmatmul.msk.f32.gmra.mxu0 %vm696_vm0, %v1984_v18  ;;  %v529_v18 = vpop.permute.xlu0 %528 }
  0xe0   : > { %1791 = vmatmul.msk.f32.gmra.mxu0 %vm696_vm0, %v1986_v21  ;;  %v605_v21 = vmul.f32 %v2463_v41, %v529_v18  ;;  %v544_v39 = vpop.permute.xlu0 %543 }
  0xe1   : > { %v608_v44 = vmul.f32 %v2463_v41, %v544_v39 }
  0xe2   : > { %v641_v22 = vadd.f32 %v2468_v42, %v605_v21 }
  0xe3   : > { %v644_v45 = vadd.f32 %v2468_v42, %v608_v44 }
  0xe8   : > { %1792 = vmatmul.msk.f32.gmra.mxu0 %vm696_vm0, %v1988_v26 }
  0xf0   : > { %1793 = vmatmul.msk.f32.gmra.mxu0 %vm696_vm0, %v1990_v30 }
  0xf8   : > { %1794 = vmatmul.msk.f32.gmra.mxu0 %vm696_vm0, %v1992_v37 }
 0x100   : > { %1795 = vmatmul.msk.f32.gmra.mxu0 %vm696_vm0, %v1994_v48  ;;  %v549_v48 = vpop.permute.xlu1 %548 }
 0x101   : > { %v609_v51 = vmul.f32 %v2463_v41, %v549_v48 }
 0x108   : > { %1796 = vmatmul.msk.f32.gmra.mxu0 %vm696_vm0, %v1996_v52  ;;  %v645_v52 = vadd.f32 %v2468_v42, %v609_v51  ;;  %v2655_v51 = vld [vmem:[%s2959_s6] ss:$0 sm:$0xff] }
 0x110   : > { %1797 = vmatmul.msk.f32.gmra.mxu0 %vm696_vm0, %v1998_v55  ;;  %v554_v55 = vpop.permute.xlu2 %553 }
 0x115   : > { %v810_v60 = vpop.f32.mrf.mxu0 }
 0x116   : > { %v811_v62 = vadd.f32 %v2548_v58, %v810_v60 }
 0x118   : > { %2001 = vtanh.f32 %v811_v62  ;;  %1798 = vmatmul.msk.f32.gmra.mxu0 %vm696_vm0, %v2000_v63  ;;  %v559_v63 = vpop.permute.xlu0 %558  ;;  %v569_v13 = vpop.permute.xlu2 %568 }
 0x119   : > { %2003 = vtanh.f32 %v637_v59  ;;  %v610_v59 = vmul.f32 %v2463_v41, %v554_v55 }
 0x11b   : > { %v646_v60 = vadd.f32 %v2468_v42, %v610_v59 }
 0x11d   : > { %v813_v2 = vpop.f32.mrf.mxu0 }
 0x11e   : > { %v2002_v3 = vpop.eup %2001  ;;  %v814_v5 = vadd.f32 %v2548_v58, %v813_v2  ;;  %v611_v2 = vmul.f32 %v2463_v41, %v559_v63 }
 0x11f   : > { %v2004_v6 = vpop.eup %2003  ;;  %1814 = vmatmul.msk.f32.vlgmr.msra.gmra.mxu1 %vm696_vm0, %v2002_v3 }
 0x120   : > { %2005 = vtanh.f32 %v814_v5  ;;  %1799 = vmatmul.msk.f32.gmra.mxu0 %vm696_vm0, %v2004_v6  ;;  %v647_v3 = vadd.f32 %v2468_v42, %v611_v2  ;;  %v564_v6 = vpop.permute.xlu1 %563 }
 0x121   : > { %2007 = vtanh.f32 %v638_v1 }
 0x125   : > { %v816_v9 = vpop.f32.mrf.mxu0 }
 0x126   : > { %v2006_v10 = vpop.eup %2005  ;;  %v817_v11 = vadd.f32 %v2548_v58, %v816_v9  ;;  %v612_v9 = vmul.f32 %v2463_v41, %v564_v6 }
 0x127   : > { %v2008_v12 = vpop.eup %2007  ;;  %1815 = vmatmul.msk.f32.gmra.mxu1 %vm696_vm0, %v2006_v10 }
 0x128   : > { %2009 = vtanh.f32 %v817_v11  ;;  %1800 = vmatmul.msk.f32.gmra.mxu0 %vm696_vm0, %v2008_v12  ;;  %v648_v10 = vadd.f32 %v2468_v42, %v612_v9 }
 0x129   : > { %2011 = vtanh.f32 %v639_v8 }
 0x12d   : > { %v819_v16 = vpop.f32.mrf.mxu0 }
 0x12e   : > { %v2010_v17 = vpop.eup %2009  ;;  %v820_v19 = vadd.f32 %v2548_v58, %v819_v16  ;;  %v613_v16 = vmul.f32 %v2463_v41, %v569_v13 }
 0x12f   : > { %v2012_v20 = vpop.eup %2011  ;;  %1816 = vmatmul.msk.f32.gmra.mxu1 %vm696_vm0, %v2010_v17 }
 0x130   : > { %2013 = vtanh.f32 %v820_v19  ;;  %1801 = vmatmul.msk.f32.gmra.mxu0 %vm696_vm0, %v2012_v20  ;;  %v649_v17 = vadd.f32 %v2468_v42, %v613_v16  ;;  %v574_v20 = vpop.permute.xlu0 %573 }
 0x131   : > { %2015 = vtanh.f32 %v640_v15 }
 0x135   : > { %v822_v23 = vpop.f32.mrf.mxu0 }
 0x136   : > { %v2014_v24 = vpop.eup %2013  ;;  %v823_v26 = vadd.f32 %v2548_v58, %v822_v23 }
 0x137   : > { %v2016_v27 = vpop.eup %2015  ;;  %1817 = vmatmul.msk.f32.gmra.mxu1 %vm696_vm0, %v2014_v24  ;;  %v1197_v24 = vld [vmem:[%s2960_s7 + $0x30] sm:$0xff] }
 0x138   : > { %2017 = vtanh.f32 %v823_v26  ;;  %1802 = vmatmul.msk.f32.gmra.mxu0 %vm696_vm0, %v2016_v27  ;;  %v614_v26 = vmul.f32 %v2463_v41, %v574_v20  ;;  %v1195_v27 = vld [vmem:[%s2960_s7 + $0x20] sm:$0xff] }
 0x139   : > { %2019 = vtanh.f32 %v641_v22  ;;  %v1198_v22 = vld [vmem:[%s2960_s7 + $0x38] sm:$0xff] }
 0x13a   : > { %1307 = vmatpush.msra.mxu2 %v1198_v22  ;;  %v650_v28 = vadd.f32 %v2468_v42, %v614_v26 }
 0x13c   : > { %1308 = vmatpush.msra.mxu2 %v1197_v24 }
 0x13d   : > { %v825_v30 = vpop.f32.mrf.mxu0 }
 0x13e   : > { %v2018_v31 = vpop.eup %2017  ;;  %v826_v33 = vadd.f32 %v2548_v58, %v825_v30  ;;  %1309 = vmatpush.msra.mxu2 %v1196_v25 }
 0x13f   : > { %v2020_v34 = vpop.eup %2019  ;;  %1818 = vmatmul.msk.f32.gmra.mxu1 %vm696_vm0, %v2018_v31  ;;  %v579_v31 = vpop.permute.xlu1 %578 }
 0x140   : > { %2021 = vtanh.f32 %v826_v33  ;;  %1803 = vmatmul.msk.f32.gmra.mxu0 %vm696_vm0, %v2020_v34  ;;  %1310 = vmatpush.msra.mxu2 %v1195_v27  ;;  %v1194_v33 = vld [vmem:[%s2960_s7 + $0x18] sm:$0xff] }
 0x141   : > { %2023 = vtanh.f32 %v642_v29 }
 0x142   : > { %1311 = vmatpush.msra.mxu2 %v1194_v33 }
 0x144   : > { %1312 = vmatpush.msra.mxu2 %v1193_v35 }
 0x145   : > { %v828_v37 = vpop.f32.mrf.mxu0 }
 0x146   : > { %v2022_v38 = vpop.eup %2021  ;;  %v829_v40 = vadd.f32 %v2548_v58, %v828_v37  ;;  %v615_v37 = vmul.f32 %v2463_v41, %v579_v31 }
 0x147   : > { %v2024_v43 = vpop.eup %2023  ;;  %1819 = vmatmul.msk.f32.gmra.mxu1 %vm696_vm0, %v2022_v38  ;;  %v1191_v38 = vld [vmem:[%s2960_s7] sm:$0xff] }
 0x148   : > { %2025 = vtanh.f32 %v829_v40  ;;  %1804 = vmatmul.msk.f32.gmra.mxu0 %vm696_vm0, %v2024_v43  ;;  %v651_v39 = vadd.f32 %v2468_v42, %v615_v37 }
 0x149   : > { %2027 = vtanh.f32 %v643_v36  ;;  %v1192_v36 = vld [vmem:[%s2960_s7 + $0x8] sm:$0xff] }
 0x14a   : > { %1313 = vmatpush.msra.mxu2 %v1192_v36 }
 0x14c   : > { %1314 = vmatpush.msra.mxu2 %v1191_v38 }
 0x14d   : > { %v831_v46 = vpop.f32.mrf.mxu0 }
 0x14e   : > { %v2026_v47 = vpop.eup %2025  ;;  %v832_v49 = vadd.f32 %v2548_v58, %v831_v46 }
 0x14f   : > { %v2028_v50 = vpop.eup %2027  ;;  %1820 = vmatmul.msk.f32.gmra.mxu1 %vm696_vm0, %v2026_v47 }
 0x150   : > { %2029 = vtanh.f32 %v832_v49  ;;  %1805 = vmatmul.msk.f32.gmra.mxu0 %vm696_vm0, %v2028_v50 }
 0x151   : > { %2031 = vtanh.f32 %v644_v45 }
 0x155   : > { %v834_v53 = vpop.f32.mrf.mxu0 }
 0x156   : > { %v2030_v54 = vpop.eup %2029  ;;  %v835_v56 = vadd.f32 %v2548_v58, %v834_v53 }
 0x157   : > { %v2032_v57 = vpop.eup %2031  ;;  %1821 = vmatmul.msk.f32.gmra.mxu1 %vm696_vm0, %v2030_v54 }
 0x158   : > { %2033 = vtanh.f32 %v835_v56  ;;  %1806 = vmatmul.msk.f32.gmra.mxu0 %vm696_vm0, %v2032_v57 }
 0x159   : > { %2035 = vtanh.f32 %v645_v52 }
 0x15d   : > { %v837_v61 = vpop.f32.mrf.mxu0 }
 0x15e   : > { %v2034_v62 = vpop.eup %2033  ;;  %v838_v0 = vadd.f32 %v2548_v58, %v837_v61 }
 0x15f   : > { %v2036_v1 = vpop.eup %2035  ;;  %1822 = vmatmul.msk.f32.gmra.mxu1 %vm696_vm0, %v2034_v62 }
 0x160   : > { %2037 = vtanh.f32 %v838_v0  ;;  %1807 = vmatmul.msk.f32.gmra.mxu0 %vm696_vm0, %v2036_v1 }
 0x161   : > { %2039 = vtanh.f32 %v646_v60 }
 0x165   : > { %v840_v4 = vpop.f32.mrf.mxu0 }
 0x166   : > { %v2038_v5 = vpop.eup %2037  ;;  %v841_v7 = vadd.f32 %v2548_v58, %v840_v4 }
 0x167   : > { %v2040_v8 = vpop.eup %2039  ;;  %1823 = vmatmul.msk.f32.gmra.mxu1 %vm696_vm0, %v2038_v5 }
 0x168   : > { %2041 = vtanh.f32 %v841_v7  ;;  %1808 = vmatmul.msk.f32.gmra.mxu0 %vm696_vm0, %v2040_v8 }
 0x169   : > { %2043 = vtanh.f32 %v647_v3 }
 0x16d   : > { %v843_v11 = vpop.f32.mrf.mxu0 }
 0x16e   : > { %v2042_v12 = vpop.eup %2041  ;;  %v844_v14 = vadd.f32 %v2548_v58, %v843_v11 }
 0x16f   : > { %v2044_v15 = vpop.eup %2043  ;;  %1824 = vmatmul.msk.f32.gmra.mxu1 %vm696_vm0, %v2042_v12 }
 0x170   : > { %2045 = vtanh.f32 %v844_v14  ;;  %1809 = vmatmul.msk.f32.gmra.mxu0 %vm696_vm0, %v2044_v15 }
 0x171   : > { %2047 = vtanh.f32 %v648_v10 }
 0x175   : > { %v846_v18 = vpop.f32.mrf.mxu0 }
 0x176   : > { %v2046_v19 = vpop.eup %2045  ;;  %v847_v21 = vadd.f32 %v2548_v58, %v846_v18 }
 0x177   : > { %v2048_v23 = vpop.eup %2047  ;;  %1825 = vmatmul.msk.f32.gmra.mxu1 %vm696_vm0, %v2046_v19 }
 0x178   : > { %2049 = vtanh.f32 %v847_v21  ;;  %1810 = vmatmul.msk.f32.gmra.mxu0 %vm696_vm0, %v2048_v23 }
 0x179   : > { %2051 = vtanh.f32 %v649_v17 }
 0x17d   : > { %v849_v29 = vpop.f32.mrf.mxu0 }
 0x17e   : > { %v2050_v30 = vpop.eup %2049  ;;  %v850_v32 = vadd.f32 %v2548_v58, %v849_v29 }
 0x17f   : > { %v2052_v34 = vpop.eup %2051  ;;  %1826 = vmatmul.msk.f32.gmra.mxu1 %vm696_vm0, %v2050_v30 }
 0x180   : > { %2053 = vtanh.f32 %v850_v32  ;;  %1811 = vmatmul.msk.f32.gmra.mxu0 %vm696_vm0, %v2052_v34 }
 0x181   : > { %2055 = vtanh.f32 %v650_v28 }
 0x185   : > { %v852_v40 = vpop.f32.mrf.mxu0 }
 0x186   : > { %v2054_v43 = vpop.eup %2053  ;;  %v853_v44 = vadd.f32 %v2548_v58, %v852_v40 }
 0x187   : > { %v2056_v45 = vpop.eup %2055  ;;  %1827 = vmatmul.msk.f32.gmra.mxu1 %vm696_vm0, %v2054_v43 }
 0x188   : > { %2057 = vtanh.f32 %v853_v44  ;;  %1812 = vmatmul.msk.f32.gmra.mxu0 %vm696_vm0, %v2056_v45 }
 0x189   : > { %2059 = vtanh.f32 %v651_v39 }
 0x18d   : > { %v855_v41 = vpop.f32.mrf.mxu0 }
 0x18e   : > { %v2058_v46 = vpop.eup %2057  ;;  %v856_v47 = vadd.f32 %v2548_v58, %v855_v41 }
 0x18f   : > { %v2060_v48 = vpop.eup %2059  ;;  %1828 = vmatmul.msk.f32.gmra.mxu1 %vm696_vm0, %v2058_v46 }
 0x190   : > { %2061 = vtanh.f32 %v856_v47  ;;  %1813 = vmatmul.msk.f32.gmra.mxu0 %vm696_vm0, %v2060_v48 }
 0x195   : > { %v858_v42 = vpop.f32.mrf.mxu0 }
 0x196   : > { %v2062_v49 = vpop.eup %2061  ;;  %v859_v50 = vadd.f32 %v2548_v58, %v858_v42 }
 0x197   : > { %1829 = vmatmul.msk.f32.gmra.mxu1 %vm696_vm0, %v2062_v49 }
 0x198   : > { %2063 = vtanh.f32 %v859_v50 }
 0x19c   : > { %v1063_v52 = vpop.f32.mrf.mxu1 }
 0x19d   : > { %v1064_v53 = vadd.f32 %v2655_v51, %v1063_v52  ;;  %v861_v54 = vpop.f32.mrf.mxu0 }
 0x19e   : > { %v2064_v55 = vpop.eup %2063  ;;  %v862_v56 = vadd.f32 %v2548_v58, %v861_v54 }
 0x19f   : > { %2065 = vtanh.f32 %v1064_v53  ;;  %1830 = vmatmul.msk.f32.gmra.mxu1 %vm696_vm0, %v2064_v55 }
 0x1a0   : > { %2067 = vtanh.f32 %v862_v56 }
 0x1a4   : > { %v1066_v57 = vpop.f32.mrf.mxu1 }
 0x1a5   : > { %v2066_v59 = vpop.eup %2065  ;;  %v1067_v60 = vadd.f32 %v2655_v51, %v1066_v57  ;;  %v864_v61 = vpop.f32.mrf.mxu0 }
 0x1a6   : > { %v2068_v62 = vpop.eup %2067  ;;  %v865_v63 = vadd.f32 %v2548_v58, %v864_v61  ;;  %1846 = vmatmul.msk.f32.vlgmr.msra.gmra.mxu2 %vm696_vm0, %v2066_v59 }
 0x1a7   : > { %2069 = vtanh.f32 %v1067_v60  ;;  %1831 = vmatmul.msk.f32.gmra.mxu1 %vm696_vm0, %v2068_v62 }
 0x1a8   : > { %2071 = vtanh.f32 %v865_v63 }
 0x1ac   : > { %v1069_v0 = vpop.f32.mrf.mxu1 }
 0x1ad   : > { %v2070_v1 = vpop.eup %2069  ;;  %v1070_v2 = vadd.f32 %v2655_v51, %v1069_v0  ;;  %v867_v3 = vpop.f32.mrf.mxu0 }
 0x1ae   : > { %v2072_v4 = vpop.eup %2071  ;;  %v868_v5 = vadd.f32 %v2548_v58, %v867_v3  ;;  %1847 = vmatmul.msk.f32.gmra.mxu2 %vm696_vm0, %v2070_v1 }
 0x1af   : > { %2073 = vtanh.f32 %v1070_v2  ;;  %1832 = vmatmul.msk.f32.gmra.mxu1 %vm696_vm0, %v2072_v4  ;;  %v1451_v4 = vld [vmem:[%s2962_s9 + $0x38] sm:$0xff] }
 0x1b0   : > { %2075 = vtanh.f32 %v868_v5  ;;  %1560 = vmatpush.msra.mxu3 %v1451_v4 }
 0x1b4   : > { %v1072_v6 = vpop.f32.mrf.mxu1 }
 0x1b5   : > { %v2074_v7 = vpop.eup %2073  ;;  %v1073_v8 = vadd.f32 %v2655_v51, %v1072_v6  ;;  %v870_v9 = vpop.f32.mrf.mxu0 }
 0x1b6   : > { %v2076_v10 = vpop.eup %2075  ;;  %v871_v11 = vadd.f32 %v2548_v58, %v870_v9  ;;  %1848 = vmatmul.msk.f32.gmra.mxu2 %vm696_vm0, %v2074_v7  ;;  %v1450_v9 = vld [vmem:[%s2962_s9 + $0x30] sm:$0xff] }
 0x1b7   : > { %2077 = vtanh.f32 %v1073_v8  ;;  %1833 = vmatmul.msk.f32.gmra.mxu1 %vm696_vm0, %v2076_v10  ;;  %1561 = vmatpush.msra.mxu3 %v1450_v9 }
 0x1b8   : > { %2079 = vtanh.f32 %v871_v11 }
 0x1bc   : > { %v1075_v12 = vpop.f32.mrf.mxu1 }
 0x1bd   : > { %v2078_v13 = vpop.eup %2077  ;;  %v1076_v14 = vadd.f32 %v2655_v51, %v1075_v12  ;;  %v873_v15 = vpop.f32.mrf.mxu0  ;;  %v1449_v12 = vld [vmem:[%s2962_s9 + $0x28] sm:$0xff] }
 0x1be   : > { %v2080_v16 = vpop.eup %2079  ;;  %v874_v17 = vadd.f32 %v2548_v58, %v873_v15  ;;  %1849 = vmatmul.msk.f32.gmra.mxu2 %vm696_vm0, %v2078_v13  ;;  %1562 = vmatpush.msra.mxu3 %v1449_v12  ;;  %v1448_v13 = vld [vmem:[%s2962_s9 + $0x20] sm:$0xff] }
 0x1bf   : > { %2081 = vtanh.f32 %v1076_v14  ;;  %1834 = vmatmul.msk.f32.gmra.mxu1 %vm696_vm0, %v2080_v16  ;;  %v1447_v14 = vld [vmem:[%s2962_s9 + $0x18] sm:$0xff] }
 0x1c0   : > { %2083 = vtanh.f32 %v874_v17  ;;  %1563 = vmatpush.msra.mxu3 %v1448_v13 }
 0x1c2   : > { %1564 = vmatpush.msra.mxu3 %v1447_v14 }
 0x1c4   : > { %v1078_v18 = vpop.f32.mrf.mxu1 }
 0x1c5   : > { %v2082_v19 = vpop.eup %2081  ;;  %v1079_v20 = vadd.f32 %v2655_v51, %v1078_v18  ;;  %v876_v21 = vpop.f32.mrf.mxu0 }
 0x1c6   : > { %v2084_v22 = vpop.eup %2083  ;;  %v877_v23 = vadd.f32 %v2548_v58, %v876_v21  ;;  %1850 = vmatmul.msk.f32.gmra.mxu2 %vm696_vm0, %v2082_v19  ;;  %v1446_v19 = vld [vmem:[%s2962_s9 + $0x10] sm:$0xff] }
 0x1c7   : > { %2085 = vtanh.f32 %v1079_v20  ;;  %1835 = vmatmul.msk.f32.gmra.mxu1 %vm696_vm0, %v2084_v22  ;;  %1565 = vmatpush.msra.mxu3 %v1446_v19  ;;  %v1445_v22 = vld [vmem:[%s2962_s9 + $0x8] sm:$0xff] }
 0x1c8   : > { %2087 = vtanh.f32 %v877_v23  ;;  %v1444_v23 = vld [vmem:[%s2962_s9] sm:$0xff] }
 0x1c9   : > { %1566 = vmatpush.msra.mxu3 %v1445_v22 }
 0x1cb   : > { %1567 = vmatpush.msra.mxu3 %v1444_v23 }
 0x1cc   : > { %v1081_v24 = vpop.f32.mrf.mxu1 }
 0x1cd   : > { %v2086_v25 = vpop.eup %2085  ;;  %v1082_v26 = vadd.f32 %v2655_v51, %v1081_v24  ;;  %v879_v27 = vpop.f32.mrf.mxu0 }
 0x1ce   : > { %v2088_v28 = vpop.eup %2087  ;;  %v880_v29 = vadd.f32 %v2548_v58, %v879_v27  ;;  %1851 = vmatmul.msk.f32.gmra.mxu2 %vm696_vm0, %v2086_v25 }
 0x1cf   : > { %2089 = vtanh.f32 %v1082_v26  ;;  %1836 = vmatmul.msk.f32.gmra.mxu1 %vm696_vm0, %v2088_v28 }
 0x1d0   : > { %2091 = vtanh.f32 %v880_v29 }
 0x1d4   : > { %v1084_v30 = vpop.f32.mrf.mxu1 }
 0x1d5   : > { %v2090_v31 = vpop.eup %2089  ;;  %v1085_v32 = vadd.f32 %v2655_v51, %v1084_v30  ;;  %v882_v33 = vpop.f32.mrf.mxu0 }
 0x1d6   : > { %v2092_v34 = vpop.eup %2091  ;;  %v883_v35 = vadd.f32 %v2548_v58, %v882_v33  ;;  %1852 = vmatmul.msk.f32.gmra.mxu2 %vm696_vm0, %v2090_v31  ;;  %v2750_v33 = vld [vmem:[%s2961_s8] ss:$0 sm:$0xff] }
 0x1d7   : > { %2093 = vtanh.f32 %v1085_v32  ;;  %1837 = vmatmul.msk.f32.gmra.mxu1 %vm696_vm0, %v2092_v34 }
 0x1d8   : > { %2095 = vtanh.f32 %v883_v35 }
 0x1dc   : > { %v1087_v36 = vpop.f32.mrf.mxu1 }
 0x1dd   : > { %v2094_v37 = vpop.eup %2093  ;;  %v1088_v38 = vadd.f32 %v2655_v51, %v1087_v36  ;;  %v885_v39 = vpop.f32.mrf.mxu0 }
 0x1de   : > { %v2096_v40 = vpop.eup %2095  ;;  %v886_v43 = vadd.f32 %v2548_v58, %v885_v39  ;;  %1853 = vmatmul.msk.f32.gmra.mxu2 %vm696_vm0, %v2094_v37 }
 0x1df   : > { %2097 = vtanh.f32 %v1088_v38  ;;  %1838 = vmatmul.msk.f32.gmra.mxu1 %vm696_vm0, %v2096_v40 }
 0x1e0   : > { %2099 = vtanh.f32 %v886_v43 }
 0x1e4   : > { %v1090_v44 = vpop.f32.mrf.mxu1 }
 0x1e5   : > { %v2098_v45 = vpop.eup %2097  ;;  %v1091_v41 = vadd.f32 %v2655_v51, %v1090_v44  ;;  %v888_v46 = vpop.f32.mrf.mxu0 }
 0x1e6   : > { %v2100_v47 = vpop.eup %2099  ;;  %v889_v48 = vadd.f32 %v2548_v58, %v888_v46  ;;  %1854 = vmatmul.msk.f32.gmra.mxu2 %vm696_vm0, %v2098_v45 }
 0x1e7   : > { %2101 = vtanh.f32 %v1091_v41  ;;  %1839 = vmatmul.msk.f32.gmra.mxu1 %vm696_vm0, %v2100_v47 }
 0x1e8   : > { %2103 = vtanh.f32 %v889_v48 }
 0x1ec   : > { %v1093_v42 = vpop.f32.mrf.mxu1 }
 0x1ed   : > { %v2102_v49 = vpop.eup %2101  ;;  %v1094_v50 = vadd.f32 %v2655_v51, %v1093_v42  ;;  %v891_v52 = vpop.f32.mrf.mxu0 }
 0x1ee   : > { %v2104_v53 = vpop.eup %2103  ;;  %v892_v54 = vadd.f32 %v2548_v58, %v891_v52  ;;  %1855 = vmatmul.msk.f32.gmra.mxu2 %vm696_vm0, %v2102_v49 }
 0x1ef   : > { %2105 = vtanh.f32 %v1094_v50  ;;  %1840 = vmatmul.msk.f32.gmra.mxu1 %vm696_vm0, %v2104_v53 }
 0x1f0   : > { %2107 = vtanh.f32 %v892_v54 }
 0x1f4   : > { %v1096_v55 = vpop.f32.mrf.mxu1 }
 0x1f5   : > { %v2106_v56 = vpop.eup %2105  ;;  %v1097_v57 = vadd.f32 %v2655_v51, %v1096_v55  ;;  %v894_v59 = vpop.f32.mrf.mxu0 }
 0x1f6   : > { %v2108_v60 = vpop.eup %2107  ;;  %v895_v61 = vadd.f32 %v2548_v58, %v894_v59  ;;  %1856 = vmatmul.msk.f32.gmra.mxu2 %vm696_vm0, %v2106_v56 }
 0x1f7   : > { %2109 = vtanh.f32 %v1097_v57  ;;  %1841 = vmatmul.msk.f32.gmra.mxu1 %vm696_vm0, %v2108_v60 }
 0x1f8   : > { %2111 = vtanh.f32 %v895_v61 }
 0x1fc   : > { %v1099_v62 = vpop.f32.mrf.mxu1 }
 0x1fd   : > { %v2110_v63 = vpop.eup %2109  ;;  %v1100_v0 = vadd.f32 %v2655_v51, %v1099_v62  ;;  %v897_v1 = vpop.f32.mrf.mxu0 }
 0x1fe   : > { %v2112_v2 = vpop.eup %2111  ;;  %v898_v3 = vadd.f32 %v2548_v58, %v897_v1  ;;  %1857 = vmatmul.msk.f32.gmra.mxu2 %vm696_vm0, %v2110_v63 }
 0x1ff   : > { %2113 = vtanh.f32 %v1100_v0  ;;  %1842 = vmatmul.msk.f32.gmra.mxu1 %vm696_vm0, %v2112_v2 }
 0x200   : > { %2115 = vtanh.f32 %v898_v3 }
 0x204   : > { %v1102_v5 = vpop.f32.mrf.mxu1 }
 0x205   : > { %v2114_v6 = vpop.eup %2113  ;;  %v1103_v7 = vadd.f32 %v2655_v51, %v1102_v5  ;;  %v900_v8 = vpop.f32.mrf.mxu0 }
 0x206   : > { %v2116_v10 = vpop.eup %2115  ;;  %v901_v11 = vadd.f32 %v2548_v58, %v900_v8  ;;  %1858 = vmatmul.msk.f32.gmra.mxu2 %vm696_vm0, %v2114_v6 }
 0x207   : > { %2117 = vtanh.f32 %v1103_v7  ;;  %1843 = vmatmul.msk.f32.gmra.mxu1 %vm696_vm0, %v2116_v10 }
 0x208   : > { %2119 = vtanh.f32 %v901_v11 }
 0x20c   : > { %v1105_v15 = vpop.f32.mrf.mxu1 }
 0x20d   : > { %v2118_v16 = vpop.eup %2117  ;;  %v1106_v17 = vadd.f32 %v2655_v51, %v1105_v15  ;;  %v903_v18 = vpop.f32.mrf.mxu0 }
 0x20e   : > { %v2120_v20 = vpop.eup %2119  ;;  %v904_v21 = vadd.f32 %v2548_v58, %v903_v18  ;;  %1859 = vmatmul.msk.f32.gmra.mxu2 %vm696_vm0, %v2118_v16 }
 0x20f   : > { %2121 = vtanh.f32 %v1106_v17  ;;  %1844 = vmatmul.msk.f32.gmra.mxu1 %vm696_vm0, %v2120_v20 }
 0x210   : > { %2123 = vtanh.f32 %v904_v21 }
 0x214   : > { %v1108_v24 = vpop.f32.mrf.mxu1 }
 0x215   : > { %v2122_v25 = vpop.eup %2121  ;;  %v1109_v58 = vadd.f32 %v2655_v51, %v1108_v24 }
 0x216   : > { %v2124_v26 = vpop.eup %2123  ;;  %1860 = vmatmul.msk.f32.gmra.mxu2 %vm696_vm0, %v2122_v25 }
 0x217   : > { %2125 = vtanh.f32 %v1109_v58  ;;  %1845 = vmatmul.msk.f32.gmra.mxu1 %vm696_vm0, %v2124_v26 }
 0x21c   : > { %v1111_v27 = vpop.f32.mrf.mxu1 }
 0x21d   : > { %v2126_v28 = vpop.eup %2125  ;;  %v1112_v29 = vadd.f32 %v2655_v51, %v1111_v27 }
 0x21e   : > { %1861 = vmatmul.msk.f32.gmra.mxu2 %vm696_vm0, %v2126_v28 }
 0x21f   : > { %2127 = vtanh.f32 %v1112_v29 }
 0x224   : > { %v1114_v30 = vpop.f32.mrf.mxu1 }
 0x225   : > { %v2128_v31 = vpop.eup %2127  ;;  %v1115_v32 = vadd.f32 %v2655_v51, %v1114_v30 }
 0x226   : > { %1862 = vmatmul.msk.f32.gmra.mxu2 %vm696_vm0, %v2128_v31 }
 0x227   : > { %2129 = vtanh.f32 %v1115_v32 }
 0x229   : > { %v1316_v34 = vpop.f32.mrf.mxu2 }
 0x22a   : > { %v1317_v35 = vadd.f32 %v2750_v33, %v1316_v34 }
 0x22c   : > { %2131 = vtanh.f32 %v1317_v35  ;;  %v1117_v36 = vpop.f32.mrf.mxu1 }
 0x22d   : > { %v2130_v37 = vpop.eup %2129  ;;  %v1118_v38 = vadd.f32 %v2655_v51, %v1117_v36 }
 0x22e   : > { %1863 = vmatmul.msk.f32.gmra.mxu2 %vm696_vm0, %v2130_v37 }
 0x22f   : > { %2133 = vtanh.f32 %v1118_v38 }
 0x231   : > { %v1319_v39 = vpop.f32.mrf.mxu2 }
 0x232   : > { %v2132_v40 = vpop.eup %2131  ;;  %v1320_v43 = vadd.f32 %v2750_v33, %v1319_v39 }
 0x233   : > { %1878 = vmatmul.msk.f32.vlgmr.msra.gmra.mxu3 %vm696_vm0, %v2132_v40 }
 0x234   : > { %2135 = vtanh.f32 %v1320_v43  ;;  %v1120_v44 = vpop.f32.mrf.mxu1 }
 0x235   : > { %v2134_v45 = vpop.eup %2133  ;;  %v1121_v41 = vadd.f32 %v2655_v51, %v1120_v44 }
 0x236   : > { %1864 = vmatmul.msk.f32.gmra.mxu2 %vm696_vm0, %v2134_v45 }
 0x237   : > { %2137 = vtanh.f32 %v1121_v41 }
 0x239   : > { %v1322_v46 = vpop.f32.mrf.mxu2 }
 0x23a   : > { %v2136_v47 = vpop.eup %2135  ;;  %v1323_v48 = vadd.f32 %v2750_v33, %v1322_v46 }
 0x23b   : > { %1879 = vmatmul.msk.f32.gmra.mxu3 %vm696_vm0, %v2136_v47 }
 0x23c   : > { %2139 = vtanh.f32 %v1323_v48  ;;  %v1123_v42 = vpop.f32.mrf.mxu1 }
 0x23d   : > { %v2138_v49 = vpop.eup %2137  ;;  %v1124_v50 = vadd.f32 %v2655_v51, %v1123_v42 }
 0x23e   : > { %1865 = vmatmul.msk.f32.gmra.mxu2 %vm696_vm0, %v2138_v49 }
 0x23f   : > { %2141 = vtanh.f32 %v1124_v50 }
 0x241   : > { %v1325_v52 = vpop.f32.mrf.mxu2 }
 0x242   : > { %v2140_v53 = vpop.eup %2139  ;;  %v1326_v54 = vadd.f32 %v2750_v33, %v1325_v52 }
 0x243   : > { %1880 = vmatmul.msk.f32.gmra.mxu3 %vm696_vm0, %v2140_v53 }
 0x244   : > { %2143 = vtanh.f32 %v1326_v54  ;;  %v1126_v55 = vpop.f32.mrf.mxu1 }
 0x245   : > { %v2142_v56 = vpop.eup %2141  ;;  %v1127_v57 = vadd.f32 %v2655_v51, %v1126_v55 }
 0x246   : > { %1866 = vmatmul.msk.f32.gmra.mxu2 %vm696_vm0, %v2142_v56 }
 0x247   : > { %2145 = vtanh.f32 %v1127_v57 }
 0x249   : > { %v1328_v59 = vpop.f32.mrf.mxu2 }
 0x24a   : > { %v2144_v60 = vpop.eup %2143  ;;  %v1329_v61 = vadd.f32 %v2750_v33, %v1328_v59 }
 0x24b   : > { %1881 = vmatmul.msk.f32.gmra.mxu3 %vm696_vm0, %v2144_v60 }
 0x24c   : > { %2147 = vtanh.f32 %v1329_v61  ;;  %v1129_v62 = vpop.f32.mrf.mxu1 }
 0x24d   : > { %v2146_v63 = vpop.eup %2145  ;;  %v1130_v0 = vadd.f32 %v2655_v51, %v1129_v62 }
 0x24e   : > { %1867 = vmatmul.msk.f32.gmra.mxu2 %vm696_vm0, %v2146_v63 }
 0x24f   : > { %2149 = vtanh.f32 %v1130_v0 }
 0x251   : > { %v1331_v1 = vpop.f32.mrf.mxu2 }
 0x252   : > { %v2148_v2 = vpop.eup %2147  ;;  %v1332_v3 = vadd.f32 %v2750_v33, %v1331_v1 }
 0x253   : > { %1882 = vmatmul.msk.f32.gmra.mxu3 %vm696_vm0, %v2148_v2 }
 0x254   : > { %2151 = vtanh.f32 %v1332_v3  ;;  %v1132_v4 = vpop.f32.mrf.mxu1 }
 0x255   : > { %v2150_v5 = vpop.eup %2149  ;;  %v1133_v6 = vadd.f32 %v2655_v51, %v1132_v4 }
 0x256   : > { %1868 = vmatmul.msk.f32.gmra.mxu2 %vm696_vm0, %v2150_v5  ;;  %v2822_v5 = vld [vmem:[%s2963_s10] ss:$0 sm:$0xff] }
 0x257   : > { %2153 = vtanh.f32 %v1133_v6 }
 0x259   : > { %v1334_v7 = vpop.f32.mrf.mxu2 }
 0x25a   : > { %v2152_v8 = vpop.eup %2151  ;;  %v1335_v9 = vadd.f32 %v2750_v33, %v1334_v7 }
 0x25b   : > { %1883 = vmatmul.msk.f32.gmra.mxu3 %vm696_vm0, %v2152_v8 }
 0x25c   : > { %2155 = vtanh.f32 %v1335_v9  ;;  %v1135_v10 = vpop.f32.mrf.mxu1 }
 0x25d   : > { %v2154_v11 = vpop.eup %2153  ;;  %v1136_v12 = vadd.f32 %v2655_v51, %v1135_v10 }
 0x25e   : > { %1869 = vmatmul.msk.f32.gmra.mxu2 %vm696_vm0, %v2154_v11 }
 0x25f   : > { %2157 = vtanh.f32 %v1136_v12 }
 0x261   : > { %v1337_v13 = vpop.f32.mrf.mxu2 }
 0x262   : > { %v2156_v14 = vpop.eup %2155  ;;  %v1338_v15 = vadd.f32 %v2750_v33, %v1337_v13 }
 0x263   : > { %1884 = vmatmul.msk.f32.gmra.mxu3 %vm696_vm0, %v2156_v14 }
 0x264   : > { %2159 = vtanh.f32 %v1338_v15  ;;  %v1138_v16 = vpop.f32.mrf.mxu1 }
 0x265   : > { %v2158_v17 = vpop.eup %2157  ;;  %v1139_v18 = vadd.f32 %v2655_v51, %v1138_v16 }
 0x266   : > { %1870 = vmatmul.msk.f32.gmra.mxu2 %vm696_vm0, %v2158_v17 }
 0x267   : > { %2161 = vtanh.f32 %v1139_v18 }
 0x269   : > { %v1340_v19 = vpop.f32.mrf.mxu2 }
 0x26a   : > { %v2160_v20 = vpop.eup %2159  ;;  %v1341_v21 = vadd.f32 %v2750_v33, %v1340_v19 }
 0x26b   : > { %1885 = vmatmul.msk.f32.gmra.mxu3 %vm696_vm0, %v2160_v20 }
 0x26c   : > { %2163 = vtanh.f32 %v1341_v21  ;;  %v1141_v22 = vpop.f32.mrf.mxu1 }
 0x26d   : > { %v2162_v23 = vpop.eup %2161  ;;  %v1142_v24 = vadd.f32 %v2655_v51, %v1141_v22 }
 0x26e   : > { %1871 = vmatmul.msk.f32.gmra.mxu2 %vm696_vm0, %v2162_v23 }
 0x26f   : > { %2165 = vtanh.f32 %v1142_v24 }
 0x271   : > { %v1343_v25 = vpop.f32.mrf.mxu2 }
 0x272   : > { %v2164_v58 = vpop.eup %2163  ;;  %v1344_v26 = vadd.f32 %v2750_v33, %v1343_v25 }
 0x273   : > { %1886 = vmatmul.msk.f32.gmra.mxu3 %vm696_vm0, %v2164_v58 }
 0x274   : > { %2167 = vtanh.f32 %v1344_v26  ;;  %v1144_v27 = vpop.f32.mrf.mxu1 }
 0x275   : > { %v2166_v28 = vpop.eup %2165  ;;  %v1145_v29 = vadd.f32 %v2655_v51, %v1144_v27 }
 0x276   : > { %1872 = vmatmul.msk.f32.gmra.mxu2 %vm696_vm0, %v2166_v28 }
 0x277   : > { %2169 = vtanh.f32 %v1145_v29 }
 0x279   : > { %v1346_v30 = vpop.f32.mrf.mxu2 }
 0x27a   : > { %v2168_v31 = vpop.eup %2167  ;;  %v1347_v32 = vadd.f32 %v2750_v33, %v1346_v30 }
 0x27b   : > { %1887 = vmatmul.msk.f32.gmra.mxu3 %vm696_vm0, %v2168_v31 }
 0x27c   : > { %2171 = vtanh.f32 %v1347_v32  ;;  %v1147_v34 = vpop.f32.mrf.mxu1 }
 0x27d   : > { %v2170_v35 = vpop.eup %2169  ;;  %v1148_v36 = vadd.f32 %v2655_v51, %v1147_v34 }
 0x27e   : > { %1873 = vmatmul.msk.f32.gmra.mxu2 %vm696_vm0, %v2170_v35 }
 0x27f   : > { %2173 = vtanh.f32 %v1148_v36 }
 0x281   : > { %v1349_v37 = vpop.f32.mrf.mxu2 }
 0x282   : > { %v2172_v38 = vpop.eup %2171  ;;  %v1350_v39 = vadd.f32 %v2750_v33, %v1349_v37 }
 0x283   : > { %1888 = vmatmul.msk.f32.gmra.mxu3 %vm696_vm0, %v2172_v38 }
 0x284   : > { %2175 = vtanh.f32 %v1350_v39  ;;  %v1150_v40 = vpop.f32.mrf.mxu1 }
 0x285   : > { %v2174_v43 = vpop.eup %2173  ;;  %v1151_v44 = vadd.f32 %v2655_v51, %v1150_v40 }
 0x286   : > { %1874 = vmatmul.msk.f32.gmra.mxu2 %vm696_vm0, %v2174_v43 }
 0x287   : > { %2177 = vtanh.f32 %v1151_v44 }
 0x289   : > { %v1352_v45 = vpop.f32.mrf.mxu2 }
 0x28a   : > { %v2176_v41 = vpop.eup %2175  ;;  %v1353_v46 = vadd.f32 %v2750_v33, %v1352_v45 }
 0x28b   : > { %1889 = vmatmul.msk.f32.gmra.mxu3 %vm696_vm0, %v2176_v41 }
 0x28c   : > { %2179 = vtanh.f32 %v1353_v46  ;;  %v1153_v47 = vpop.f32.mrf.mxu1 }
 0x28d   : > { %v2178_v48 = vpop.eup %2177  ;;  %v1154_v42 = vadd.f32 %v2655_v51, %v1153_v47 }
 0x28e   : > { %1875 = vmatmul.msk.f32.gmra.mxu2 %vm696_vm0, %v2178_v48 }
 0x28f   : > { %2181 = vtanh.f32 %v1154_v42 }
 0x291   : > { %v1355_v49 = vpop.f32.mrf.mxu2 }
 0x292   : > { %v2180_v50 = vpop.eup %2179  ;;  %v1356_v52 = vadd.f32 %v2750_v33, %v1355_v49 }
 0x293   : > { %1890 = vmatmul.msk.f32.gmra.mxu3 %vm696_vm0, %v2180_v50 }
 0x294   : > { %2183 = vtanh.f32 %v1356_v52  ;;  %v1156_v53 = vpop.f32.mrf.mxu1 }
 0x295   : > { %v2182_v54 = vpop.eup %2181  ;;  %v1157_v55 = vadd.f32 %v2655_v51, %v1156_v53 }
 0x296   : > { %1876 = vmatmul.msk.f32.gmra.mxu2 %vm696_vm0, %v2182_v54 }
 0x297   : > { %2185 = vtanh.f32 %v1157_v55 }
 0x299   : > { %v1358_v56 = vpop.f32.mrf.mxu2 }
 0x29a   : > { %v2184_v57 = vpop.eup %2183  ;;  %v1359_v59 = vadd.f32 %v2750_v33, %v1358_v56 }
 0x29b   : > { %1891 = vmatmul.msk.f32.gmra.mxu3 %vm696_vm0, %v2184_v57 }
 0x29c   : > { %2187 = vtanh.f32 %v1359_v59 }
 0x29d   : > { %v2186_v60 = vpop.eup %2185 }
 0x29e   : > { %1877 = vmatmul.msk.f32.gmra.mxu2 %vm696_vm0, %v2186_v60 }
 0x2a1   : > { %v1361_v61 = vpop.f32.mrf.mxu2 }
 0x2a2   : > { %v2188_v62 = vpop.eup %2187  ;;  %v1362_v63 = vadd.f32 %v2750_v33, %v1361_v61 }
 0x2a3   : > { %1892 = vmatmul.msk.f32.gmra.mxu3 %vm696_vm0, %v2188_v62 }
 0x2a4   : > { %2189 = vtanh.f32 %v1362_v63 }
 0x2a9   : > { %v1364_v51 = vpop.f32.mrf.mxu2 }
 0x2aa   : > { %v2190_v0 = vpop.eup %2189  ;;  %v1365_v1 = vadd.f32 %v2750_v33, %v1364_v51 }
 0x2ab   : > { %1893 = vmatmul.msk.f32.gmra.mxu3 %vm696_vm0, %v2190_v0 }
 0x2ac   : > { %2191 = vtanh.f32 %v1365_v1 }
 0x2b1   : > { %v1367_v2 = vpop.f32.mrf.mxu2 }
 0x2b2   : > { %v2192_v3 = vpop.eup %2191  ;;  %v1368_v4 = vadd.f32 %v2750_v33, %v1367_v2 }
 0x2b3   : > { %1894 = vmatmul.msk.f32.gmra.mxu3 %vm696_vm0, %v2192_v3 }
 0x2b4   : > { %2193 = vtanh.f32 %v1368_v4 }
 0x2b6   : > { %v1569_v6 = vpop.f32.mrf.mxu3 }
 0x2b7   : > { %v1570_v7 = vadd.f32 %v2822_v5, %v1569_v6 }
 0x2b9   : > { %1665 = vst [vmem:[%s2825_s13] sm:$0xff] %v1570_v7  ;;  %v1370_v8 = vpop.f32.mrf.mxu2 }
 0x2ba   : > { %v2194_v9 = vpop.eup %2193  ;;  %v1371_v10 = vadd.f32 %v2750_v33, %v1370_v8 }
 0x2bb   : > { %1895 = vmatmul.msk.f32.gmra.mxu3 %vm696_vm0, %v2194_v9 }
 0x2bc   : > { %2195 = vtanh.f32 %v1371_v10 }
 0x2be   : > { %v1572_v11 = vpop.f32.mrf.mxu3 }
 0x2bf   : > { %v1573_v12 = vadd.f32 %v2822_v5, %v1572_v11 }
 0x2c1   : > { %1666 = vst [vmem:[%s2825_s13 + $0x8] sm:$0xff] %v1573_v12  ;;  %v1373_v13 = vpop.f32.mrf.mxu2 }
 0x2c2   : > { %v2196_v14 = vpop.eup %2195  ;;  %v1374_v15 = vadd.f32 %v2750_v33, %v1373_v13 }
 0x2c3   : > { %1896 = vmatmul.msk.f32.gmra.mxu3 %vm696_vm0, %v2196_v14 }
 0x2c4   : > { %2197 = vtanh.f32 %v1374_v15 }
 0x2c6   : > { %v1575_v16 = vpop.f32.mrf.mxu3 }
 0x2c7   : > { %v1576_v17 = vadd.f32 %v2822_v5, %v1575_v16 }
 0x2c9   : > { %1667 = vst [vmem:[%s2825_s13 + $0x10] sm:$0xff] %v1576_v17  ;;  %v1376_v18 = vpop.f32.mrf.mxu2 }
 0x2ca   : > { %v2198_v19 = vpop.eup %2197  ;;  %v1377_v20 = vadd.f32 %v2750_v33, %v1376_v18 }
 0x2cb   : > { %1897 = vmatmul.msk.f32.gmra.mxu3 %vm696_vm0, %v2198_v19 }
 0x2cc   : > { %2199 = vtanh.f32 %v1377_v20 }
 0x2ce   : > { %v1578_v21 = vpop.f32.mrf.mxu3 }
 0x2cf   : > { %v1579_v22 = vadd.f32 %v2822_v5, %v1578_v21 }
 0x2d1   : > { %1668 = vst [vmem:[%s2825_s13 + $0x18] sm:$0xff] %v1579_v22  ;;  %v1379_v23 = vpop.f32.mrf.mxu2 }
 0x2d2   : > { %v2200_v24 = vpop.eup %2199  ;;  %v1380_v25 = vadd.f32 %v2750_v33, %v1379_v23 }
 0x2d3   : > { %1898 = vmatmul.msk.f32.gmra.mxu3 %vm696_vm0, %v2200_v24 }
 0x2d4   : > { %2201 = vtanh.f32 %v1380_v25 }
 0x2d6   : > { %v1581_v58 = vpop.f32.mrf.mxu3 }
 0x2d7   : > { %v1582_v26 = vadd.f32 %v2822_v5, %v1581_v58 }
 0x2d9   : > { %1669 = vst [vmem:[%s2825_s13 + $0x20] sm:$0xff] %v1582_v26  ;;  %v1382_v27 = vpop.f32.mrf.mxu2 }
 0x2da   : > { %v2202_v28 = vpop.eup %2201  ;;  %v1383_v29 = vadd.f32 %v2750_v33, %v1382_v27 }
 0x2db   : > { %1899 = vmatmul.msk.f32.gmra.mxu3 %vm696_vm0, %v2202_v28 }
 0x2dc   : > { %2203 = vtanh.f32 %v1383_v29 }
 0x2de   : > { %v1584_v30 = vpop.f32.mrf.mxu3 }
 0x2df   : > { %v1585_v31 = vadd.f32 %v2822_v5, %v1584_v30 }
 0x2e1   : > { %1670 = vst [vmem:[%s2825_s13 + $0x28] sm:$0xff] %v1585_v31  ;;  %v1385_v32 = vpop.f32.mrf.mxu2 }
 0x2e2   : > { %v2204_v34 = vpop.eup %2203  ;;  %v1386_v35 = vadd.f32 %v2750_v33, %v1385_v32 }
 0x2e3   : > { %1900 = vmatmul.msk.f32.gmra.mxu3 %vm696_vm0, %v2204_v34 }
 0x2e4   : > { %2205 = vtanh.f32 %v1386_v35 }
 0x2e6   : > { %v1587_v36 = vpop.f32.mrf.mxu3 }
 0x2e7   : > { %v1588_v37 = vadd.f32 %v2822_v5, %v1587_v36 }
 0x2e9   : > { %1671 = vst [vmem:[%s2825_s13 + $0x30] sm:$0xff] %v1588_v37  ;;  %v1388_v38 = vpop.f32.mrf.mxu2 }
 0x2ea   : > { %v2206_v39 = vpop.eup %2205  ;;  %v1389_v40 = vadd.f32 %v2750_v33, %v1388_v38 }
 0x2eb   : > { %1901 = vmatmul.msk.f32.gmra.mxu3 %vm696_vm0, %v2206_v39 }
 0x2ec   : > { %2207 = vtanh.f32 %v1389_v40 }
 0x2ee   : > { %v1590_v43 = vpop.f32.mrf.mxu3 }
 0x2ef   : > { %v1591_v44 = vadd.f32 %v2822_v5, %v1590_v43 }
 0x2f1   : > { %1672 = vst [vmem:[%s2825_s13 + $0x38] sm:$0xff] %v1591_v44  ;;  %v1391_v45 = vpop.f32.mrf.mxu2 }
 0x2f2   : > { %v2208_v41 = vpop.eup %2207  ;;  %v1392_v46 = vadd.f32 %v2750_v33, %v1391_v45 }
 0x2f3   : > { %1902 = vmatmul.msk.f32.gmra.mxu3 %vm696_vm0, %v2208_v41 }
 0x2f4   : > { %2209 = vtanh.f32 %v1392_v46 }
 0x2f6   : > { %v1593_v47 = vpop.f32.mrf.mxu3 }
 0x2f7   : > { %v1594_v48 = vadd.f32 %v2822_v5, %v1593_v47 }
 0x2f9   : > { %1673 = vst [vmem:[%s2825_s13 + $0x40] sm:$0xff] %v1594_v48  ;;  %v1394_v42 = vpop.f32.mrf.mxu2 }
 0x2fa   : > { %v2210_v49 = vpop.eup %2209  ;;  %v1395_v50 = vadd.f32 %v2750_v33, %v1394_v42 }
 0x2fb   : > { %1903 = vmatmul.msk.f32.gmra.mxu3 %vm696_vm0, %v2210_v49 }
 0x2fc   : > { %2211 = vtanh.f32 %v1395_v50 }
 0x2fe   : > { %v1596_v52 = vpop.f32.mrf.mxu3 }
 0x2ff   : > { %v1597_v53 = vadd.f32 %v2822_v5, %v1596_v52 }
 0x301   : > { %1674 = vst [vmem:[%s2825_s13 + $0x48] sm:$0xff] %v1597_v53  ;;  %v1397_v54 = vpop.f32.mrf.mxu2 }
 0x302   : > { %v2212_v55 = vpop.eup %2211  ;;  %v1398_v56 = vadd.f32 %v2750_v33, %v1397_v54 }
 0x303   : > { %1904 = vmatmul.msk.f32.gmra.mxu3 %vm696_vm0, %v2212_v55 }
 0x304   : > { %2213 = vtanh.f32 %v1398_v56 }
 0x306   : > { %v1599_v57 = vpop.f32.mrf.mxu3 }
 0x307   : > { %v1600_v59 = vadd.f32 %v2822_v5, %v1599_v57 }
 0x309   : > { %1675 = vst [vmem:[%s2825_s13 + $0x50] sm:$0xff] %v1600_v59  ;;  %v1400_v60 = vpop.f32.mrf.mxu2 }
 0x30a   : > { %v2214_v61 = vpop.eup %2213  ;;  %v1401_v62 = vadd.f32 %v2750_v33, %v1400_v60 }
 0x30b   : > { %1905 = vmatmul.msk.f32.gmra.mxu3 %vm696_vm0, %v2214_v61 }
 0x30c   : > { %2215 = vtanh.f32 %v1401_v62 }
 0x30e   : > { %v1602_v63 = vpop.f32.mrf.mxu3 }
 0x30f   : > { %v1603_v51 = vadd.f32 %v2822_v5, %v1602_v63 }
 0x311   : > { %1676 = vst [vmem:[%s2825_s13 + $0x58] sm:$0xff] %v1603_v51  ;;  %v1403_v0 = vpop.f32.mrf.mxu2 }
 0x312   : > { %v2216_v1 = vpop.eup %2215  ;;  %v1404_v2 = vadd.f32 %v2750_v33, %v1403_v0 }
 0x313   : > { %1906 = vmatmul.msk.f32.gmra.mxu3 %vm696_vm0, %v2216_v1 }
 0x314   : > { %2217 = vtanh.f32 %v1404_v2 }
 0x316   : > { %v1605_v3 = vpop.f32.mrf.mxu3 }
 0x317   : > { %v1606_v4 = vadd.f32 %v2822_v5, %v1605_v3 }
 0x319   : > { %1677 = vst [vmem:[%s2825_s13 + $0x60] sm:$0xff] %v1606_v4  ;;  %v1406_v6 = vpop.f32.mrf.mxu2 }
 0x31a   : > { %v2218_v7 = vpop.eup %2217  ;;  %v1407_v8 = vadd.f32 %v2750_v33, %v1406_v6 }
 0x31b   : > { %1907 = vmatmul.msk.f32.gmra.mxu3 %vm696_vm0, %v2218_v7 }
 0x31c   : > { %2219 = vtanh.f32 %v1407_v8 }
 0x31e   : > { %v1608_v9 = vpop.f32.mrf.mxu3 }
 0x31f   : > { %v1609_v10 = vadd.f32 %v2822_v5, %v1608_v9 }
 0x321   : > { %1678 = vst [vmem:[%s2825_s13 + $0x68] sm:$0xff] %v1609_v10  ;;  %v1409_v11 = vpop.f32.mrf.mxu2 }
 0x322   : > { %v2220_v12 = vpop.eup %2219  ;;  %v1410_v13 = vadd.f32 %v2750_v33, %v1409_v11 }
 0x323   : > { %1908 = vmatmul.msk.f32.gmra.mxu3 %vm696_vm0, %v2220_v12 }
 0x324   : > { %2221 = vtanh.f32 %v1410_v13 }
 0x326   : > { %v1611_v14 = vpop.f32.mrf.mxu3 }
 0x327   : > { %v1612_v15 = vadd.f32 %v2822_v5, %v1611_v14 }
 0x329   : > { %1679 = vst [vmem:[%s2825_s13 + $0x70] sm:$0xff] %v1612_v15 }
 0x32a   : > { %v2222_v16 = vpop.eup %2221 }
 0x32b   : > { %1909 = vmatmul.msk.f32.gmra.mxu3 %vm696_vm0, %v2222_v16 }
 0x32e   : > { %v1614_v17 = vpop.f32.mrf.mxu3 }
 0x32f   : > { %v1615_v18 = vadd.f32 %v2822_v5, %v1614_v17 }
 0x331   : > { %1680 = vst [vmem:[%s2825_s13 + $0x78] sm:$0xff] %v1615_v18 }
 0x336   : > { %v1617_v19 = vpop.f32.mrf.mxu3 }
 0x337   : > { %v1618_v33 = vadd.f32 %v2822_v5, %v1617_v19 }
 0x339   : > { %1681 = vst [vmem:[%s2825_s13 + $0x80] sm:$0xff] %v1618_v33 }
 0x33e   : > { %v1620_v20 = vpop.f32.mrf.mxu3 }
 0x33f   : > { %v1621_v21 = vadd.f32 %v2822_v5, %v1620_v20 }
 0x341   : > { %1682 = vst [vmem:[%s2825_s13 + $0x88] sm:$0xff] %v1621_v21 }
 0x346   : > { %v1623_v22 = vpop.f32.mrf.mxu3 }
 0x347   : > { %v1624_v23 = vadd.f32 %v2822_v5, %v1623_v22 }
 0x349   : > { %1683 = vst [vmem:[%s2825_s13 + $0x90] sm:$0xff] %v1624_v23 }
 0x34e   : > { %v1626_v24 = vpop.f32.mrf.mxu3 }
 0x34f   : > { %v1627_v25 = vadd.f32 %v2822_v5, %v1626_v24 }
 0x351   : > { %1684 = vst [vmem:[%s2825_s13 + $0x98] sm:$0xff] %v1627_v25 }
 0x356   : > { %v1629_v58 = vpop.f32.mrf.mxu3 }
 0x357   : > { %v1630_v26 = vadd.f32 %v2822_v5, %v1629_v58 }
 0x359   : > { %1685 = vst [vmem:[%s2825_s13 + $0xa0] sm:$0xff] %v1630_v26 }
 0x35e   : > { %v1632_v27 = vpop.f32.mrf.mxu3 }
 0x35f   : > { %v1633_v28 = vadd.f32 %v2822_v5, %v1632_v27 }
 0x361   : > { %1686 = vst [vmem:[%s2825_s13 + $0xa8] sm:$0xff] %v1633_v28 }
 0x366   : > { %v1635_v29 = vpop.f32.mrf.mxu3 }
 0x367   : > { %v1636_v30 = vadd.f32 %v2822_v5, %v1635_v29 }
 0x369   : > { %1687 = vst [vmem:[%s2825_s13 + $0xb0] sm:$0xff] %v1636_v30 }
 0x36e   : > { %v1638_v31 = vpop.f32.mrf.mxu3 }
 0x36f   : > { %v1639_v32 = vadd.f32 %v2822_v5, %v1638_v31 }
 0x371   : > { %1688 = vst [vmem:[%s2825_s13 + $0xb8] sm:$0xff] %v1639_v32 }
 0x376   : > { %v1641_v34 = vpop.f32.mrf.mxu3 }
 0x377   : > { %v1642_v35 = vadd.f32 %v2822_v5, %v1641_v34 }
 0x379   : > { %1689 = vst [vmem:[%s2825_s13 + $0xc0] sm:$0xff] %v1642_v35 }
 0x37e   : > { %v1644_v36 = vpop.f32.mrf.mxu3 }
 0x37f   : > { %v1645_v37 = vadd.f32 %v2822_v5, %v1644_v36 }
 0x381   : > { %1690 = vst [vmem:[%s2825_s13 + $0xc8] sm:$0xff] %v1645_v37 }
 0x386   : > { %v1647_v38 = vpop.f32.mrf.mxu3 }
 0x387   : > { %v1648_v39 = vadd.f32 %v2822_v5, %v1647_v38 }
 0x389   : > { %1691 = vst [vmem:[%s2825_s13 + $0xd0] sm:$0xff] %v1648_v39 }
 0x38e   : > { %v1650_v40 = vpop.f32.mrf.mxu3 }
 0x38f   : > { %v1651_v43 = vadd.f32 %v2822_v5, %v1650_v40 }
 0x391   : > { %1692 = vst [vmem:[%s2825_s13 + $0xd8] sm:$0xff] %v1651_v43 }
 0x396   : > { %v1653_v44 = vpop.f32.mrf.mxu3 }
 0x397   : > { %v1654_v45 = vadd.f32 %v2822_v5, %v1653_v44 }
 0x399   : > { %1693 = vst [vmem:[%s2825_s13 + $0xe0] sm:$0xff] %v1654_v45 }
 0x39e   : > { %v1656_v41 = vpop.f32.mrf.mxu3 }
 0x39f   : > { %v1657_v46 = vadd.f32 %v2822_v5, %v1656_v41 }
 0x3a1   : > { %1694 = vst [vmem:[%s2825_s13 + $0xe8] sm:$0xff] %v1657_v46 }
 0x3a6   : > { %v1659_v47 = vpop.f32.mrf.mxu3 }
 0x3a7   : > { %v1660_v48 = vadd.f32 %v2822_v5, %v1659_v47 }
 0x3a9   : > { %1695 = vst [vmem:[%s2825_s13 + $0xf0] sm:$0xff] %v1660_v48 }
 0x3ae   : > { %v1662_v42 = vpop.f32.mrf.mxu3 }
 0x3af   : > { %v1663_v49 = vadd.f32 %v2822_v5, %v1662_v42 }
 0x3b1   : > { %1696 = vst [vmem:[%s2825_s13 + $0xf8] sm:$0xff] %v1663_v49 }
 0x3b2   : > { %2250 = shalt.err (!%p2247_p3)
}
 0x3b3   : > { %s2288_s25 = smov 128   ;;  %s2289_s13 = smov 8  }
 0x3b4   : > { %1916 = dma.vmem_to_hbm [thread:$0]  (%p2388_p5), %s1711_s24, 4096, %s1713_s29, %s1698_s30, %s2288_s25, %s2288_s25, %s2289_s13  }
 0x3b5 PF: > { %p1922_p4 = scmp.ge.s32.totalorder %s2285_s20, 2  ;;  %s1727_s15 = sand.u32 1, %s2273_s17  }
 0x3b6   : > { %s1728_s0 = scalar_lea.sflag [#allocation3], %s1727_s15 }
 0x3b7   : > { %p1919_p7 = pnand %p1922_p4, %p2392_p6 }
 0x3b9   : > { %p1920_p8 = pneg %p1919_p7 }
 0x3bb   : > { %2268 = dma.done.wait (%p1920_p8), %s1728_s0, 4096  }
 0x3bc   : > { %2270 = vsyncadd (%p1920_p8), %s1728_s0, 4294963200  ;;  %p21_p9 = scmp.ge.s32.totalorder %s2375_s23, 4   ;;  %s2969_s17 = smov %s2277_s18 }
 0x3bd   : > { %s2970_s18 = smov %s2281_s19  ;;  %s2971_s19 = smov %s2386_s26 }
 0x3be   : > { %s2972_s20 = smov %s2375_s23  ;;  %23 = sbr.rel (!%p21_p9) target bundleno = 5 (0x5), region = 99 }
 0x3c3   :  { %1734 = vsyncpa [#allocation3], 1 }
 0x3c4   :  { %1736 = vsyncpa [#allocation3 + $0x1], 1 }

</bundles_post_ra>
